<compile_context>
chip_gen: v7x
topology: tpu7x:2x2x1
jax: 0.10.0
libtpu: 0.0.40
codegen_flags: <defaults>
</compile_context>

<pallas_src>
from functools import partial

import jax
import jax.numpy as jnp
from jax.experimental import pallas as pl
from jax.experimental.pallas import tpu as pltpu

INPUT_SIZE = 64
HIDDEN_SIZES = [64, 32, 8]
BATCH = 1024
TILE_B = 512          # sweep 512/1024; >=256 fills the MXU, big tiles amortize step overhead
LANE = 128            # lane width all hidden activations / weight blocks are padded to


# ------------------------------------------------------------------ params ---
def _layer_dims(input_size, hidden_sizes):
    """Reproduce SeperateMLP.__init__ layer-size logic."""
    # reco branch
    reco_dims = []
    hid = list(hidden_sizes)
    ip = input_size
    hid[-1] = ip
    for hs in hid[:-1]:
        reco_dims.append((ip, hs))
        ip = hs
    reco_dims.append((ip, hid[-1]))

    # reg branch
    reg_dims = []
    hid = list(hidden_sizes)
    bottleneck = min(hid[:-1])
    ip = input_size
    for hs in hid[:-1]:
        if ip == bottleneck:
            break
        reg_dims.append((ip, hs))
        ip = hs
    reg_dims.append((ip, hid[-1]))
    return reco_dims, reg_dims


def init_params(key, input_size, hidden_sizes):
    """Deterministic init mimicking torch.nn.Linear's U(-1/sqrt(in), 1/sqrt(in)).
    Weights stored transposed as (in, out) so y = x @ W + b == torch Linear."""
    reco_dims, reg_dims = _layer_dims(input_size, hidden_sizes)

    def make(key, dims):
        params = []
        for (d_in, d_out) in dims:
            key, kw, kb = jax.random.split(key, 3)
            bound = float(d_in) ** -0.5
            w = jax.random.uniform(kw, (d_in, d_out), jnp.float32, -bound, bound)
            b = jax.random.uniform(kb, (d_out,), jnp.float32, -bound, bound)
            params.append((w, b))
        return key, params

    key, reco_params = make(key, reco_dims)
    key, reg_params = make(key, reg_dims)
    return reco_params, reg_params


def _round_up(x, m):
    return (x + m - 1) // m * m


def pack_fused_params(reco_params, reg_params, lane_width=LANE):
    """Fuse the two branches and pack ALL layers into one (rows, 128) f32 buffer.

    Layer 0:   W = [W_reco | W_reg]            (shared 64-wide input x)
    Layer i>0: W = blockdiag(W_reco, W_reg)    (lane-concatenated hidden state)
    Last layer: reg's `*10` on its final column folded into W/b (exact).

    Per-layer block layout (all 128 lanes wide, zero-padded):
      rows [0 : d_in)  = W   (d_in = kernel-visible input width: 64 for L0, 128 after)
      row  d_in        = bias
      rows up to next multiple of 8 = zero pad
    Blocks are concatenated along the sublane axis -> a single parameter DMA.
    Returns (packed, layer_meta=((row_start, d_in), ...), out_width).
    """
    assert len(reco_params) == len(reg_params), "branch fusion assumes equal depth"
    n_layers = len(reco_params)
    out_width = reco_params[-1][0].shape[1] + reg_params[-1][0].shape[1]

    blocks, meta = [], []
    row = 0
    act_width = reco_params[0][0].shape[0]          # width of activation feeding layer 0

    for li in range(n_layers):
        wr, br = (a.astype(jnp.float32) for a in reco_params[li])
        wg, bg = (a.astype(jnp.float32) for a in reg_params[li])

        if li == n_layers - 1:
            # fold reg[:, -1] *= 10 into the last layer (exact: 10*(x@v+c) = x@(10v)+10c)
            wg = wg.at[:, -1].multiply(10.0)
            bg = bg.at[-1].multiply(10.0)

        if li == 0:
            assert wr.shape[0] == wg.shape[0]
            w = jnp.concatenate([wr, wg], axis=1)
        else:
            w = jnp.block([
                [wr, jnp.zeros((wr.shape[0], wg.shape[1]), jnp.float32)],
                [jnp.zeros((wg.shape[0], wr.shape[1]), jnp.float32), wg],
            ])
        b = jnp.concatenate([br, bg], axis=0)

        d_in_act, d_out_act = w.shape
        d_in = act_width                            # kernel-visible (padded) input width
        assert d_in_act <= d_in and d_out_act <= lane_width
        rows = _round_up(d_in + 1, 8)

        buf = jnp.zeros((rows, lane_width), jnp.float32)
        buf = buf.at[:d_in_act, :d_out_act].set(w)
        buf = buf.at[d_in, :d_out_act].set(b)

        blocks.append(buf)
        meta.append((row, d_in))
        row += rows
        act_width = lane_width                      # hidden activations are 128-lane padded

    packed = jnp.concatenate(blocks, axis=0)        # (344, 128) for this config
    return packed, tuple(meta), out_width


# ------------------------------------------------------------------ kernel ---
def separate_mlp_kernel(layer_meta, out_width, x_ref, p_ref, out_ref):
    """layer_meta = ((row_start, d_in), ...); p_ref packs every layer's [W; b; pad] rows."""
    h = x_ref[...]                                          # (tile_b, 64) f32
    n_layers = len(layer_meta)
    for li, (r0, d_in) in enumerate(layer_meta):
        w = p_ref[r0:r0 + d_in, :]                          # static, 8-sublane-aligned slice
        b = p_ref[r0 + d_in:r0 + d_in + 1, :]               # bias row, broadcasts over batch
        h = jnp.dot(h, w, preferred_element_type=jnp.float32) + b
        if li < n_layers - 1:
            h = jnp.maximum(h, 0.0)
    # cols [0:out_width) hold cat(reco, reg) (reg's *10 folded into the weights);
    # zero-valued padding lanes beyond out_width are dropped at the store.
    out_ref[...] = h[:, :out_width]


# ----------------------------------------------------------------- wrapper ---
@partial(jax.jit, static_argnames=("layer_meta", "out_width", "tile_b"))
def separate_mlp_forward(x, packed, layer_meta, out_width, tile_b=TILE_B):
    n, d_feat = x.shape
    x = x.astype(jnp.float32)

    eff_tile = min(tile_b, _round_up(n, 8))
    grid = (pl.cdiv(n, eff_tile),)      # partial tail block handled by Pallas (no jnp.pad)

    flops = 2 * n * (d_feat * LANE + LANE * LANE + LANE * LANE)
    bytes_accessed = n * (d_feat + out_width) * 4 + int(packed.size) * 4

    return pl.pallas_call(
        partial(separate_mlp_kernel, layer_meta, out_width),
        out_shape=jax.ShapeDtypeStruct((n, out_width), jnp.float32),
        grid=grid,
        in_specs=[
            pl.BlockSpec((eff_tile, d_feat), lambda i: (i, 0)),
            # constant index_map: single fused parameter buffer, DMA'd once, VMEM-resident
            pl.BlockSpec(packed.shape, lambda i: (0, 0)),
        ],
        # block last dim == full array dim (72): kernel writes the exact concatenated
        # output directly -> no post-kernel slice pass
        out_specs=pl.BlockSpec((eff_tile, out_width), lambda i: (i, 0)),
        compiler_params=pltpu.CompilerParams(dimension_semantics=("parallel",)),
        cost_estimate=pl.CostEstimate(flops=flops, transcendentals=0,
                                      bytes_accessed=bytes_accessed),
    )(x, packed)


# -------------------------------------------------------------- reference ---
def separate_mlp_reference(x, reco_params, reg_params):
    h = x
    for i, (w, b) in enumerate(reco_params):
        h = h @ w + b
        if i < len(reco_params) - 1:
            h = jnp.maximum(h, 0.0)
    g = x
    for i, (w, b) in enumerate(reg_params):
        g = g @ w + b
        if i < len(reg_params) - 1:
            g = jnp.maximum(g, 0.0)
    g = g.at[:, -1].multiply(10.0)
    return jnp.concatenate([h, g], axis=1)


if __name__ == "__main__":
    key = jax.random.PRNGKey(0)
    key, kx = jax.random.split(key)

    reco_params, reg_params = init_params(key, INPUT_SIZE, HIDDEN_SIZES)
    # one-time parameter packing (kept out of the hot forward path)
    packed, layer_meta, out_width = pack_fused_params(reco_params, reg_params)
    packed = jax.block_until_ready(packed)

    out_dim = INPUT_SIZE + HIDDEN_SIZES[-1]   # 72

    # main check: 2 full grid steps at TILE_B=512 (keeps both v7x TensorCores busy)
    x = jax.random.normal(kx, (BATCH, INPUT_SIZE), dtype=jnp.float32)
    out = jax.block_until_ready(
        separate_mlp_forward(x, packed, layer_meta=layer_meta, out_width=out_width)
    )
    ref = separate_mlp_reference(x, reco_params, reg_params)
    assert out.shape == (BATCH, out_dim), out.shape
    assert jnp.allclose(out, ref, atol=1e-4, rtol=1e-4), "mismatch vs JAX reference"

    # ragged small batch: single partial block (no jnp.pad, no post-slice)
    x2 = jax.random.normal(jax.random.PRNGKey(1), (20, INPUT_SIZE), dtype=jnp.float32)
    out2 = jax.block_until_ready(
        separate_mlp_forward(x2, packed, layer_meta=layer_meta, out_width=out_width)
    )
    ref2 = separate_mlp_reference(x2, reco_params, reg_params)
    assert out2.shape == (20, out_dim), out2.shape
    assert jnp.allclose(out2, ref2, atol=1e-4, rtol=1e-4), "ragged-batch mismatch"

    # multi-step grid with a partial tail block (600 rows -> blocks of 512 + 88 valid)
    x3 = jax.random.normal(jax.random.PRNGKey(2), (600, INPUT_SIZE), dtype=jnp.float32)
    out3 = jax.block_until_ready(
        separate_mlp_forward(x3, packed, layer_meta=layer_meta, out_width=out_width)
    )
    ref3 = separate_mlp_reference(x3, reco_params, reg_params)
    assert out3.shape == (600, out_dim), out3.shape
    assert jnp.allclose(out3, ref3, atol=1e-4, rtol=1e-4), "partial-tail mismatch"

    print("KERNEL_OK")
</pallas_src>

<mosaic_0001>
module attributes {stable_mosaic.version = 11 : i64} {
  func.func @separate_mlp_kernel(%arg0: i32, %arg1: memref<512x64xf32, #tpu.memory_space<vmem>>, %arg2: memref<344x128xf32, #tpu.memory_space<vmem>>, %arg3: memref<512x72xf32, #tpu.memory_space<vmem>>) attributes {dimension_semantics = [#tpu.dimension_semantics<parallel>], iteration_bounds = array<i64: 2>, scalar_prefetch = 0 : i64, scratch_operands = 0 : i64, tpu.core_type = #tpu.core_type<tc>, window_params = [{transform_indices = @transform_0, window_bounds = array<i64: 512, 64>}, {pipeline_mode = #tpu.pipeline_mode<synchronous>, transform_indices = @transform_1, window_bounds = array<i64: 344, 128>}, {transform_indices = @transform_2, window_bounds = array<i64: 512, 72>}]} {
    %c0 = arith.constant 0 : index
    %c0_0 = arith.constant 0 : index
    %0 = vector.load %arg1[%c0, %c0_0] : memref<512x64xf32, #tpu.memory_space<vmem>>, vector<512x64xf32>
    %c0_1 = arith.constant 0 : index
    %c0_2 = arith.constant 0 : index
    %1 = vector.load %arg2[%c0_1, %c0_2] : memref<344x128xf32, #tpu.memory_space<vmem>>, vector<64x128xf32>
    %c64 = arith.constant 64 : index
    %c0_3 = arith.constant 0 : index
    %2 = vector.load %arg2[%c64, %c0_3] : memref<344x128xf32, #tpu.memory_space<vmem>>, vector<1x128xf32>
    %cst = arith.constant dense<0.000000e+00> : vector<512x128xf32>
    %3 = tpu.matmul %0, %1, %cst {dimension_numbers = #tpu.dot_dimension_numbers<[1], [0], [0], [1], [0, 0, 1, 1], [], []>} : vector<512x64xf32>, vector<64x128xf32>, vector<512x128xf32> -> vector<512x128xf32>
    %4 = vector.broadcast %2 : vector<1x128xf32> to vector<512x128xf32>
    %5 = arith.addf %3, %4 : vector<512x128xf32>
    %cst_4 = arith.constant 0.000000e+00 : f32
    %6 = vector.broadcast %cst_4 : f32 to vector<512x128xf32>
    %7 = arith.maximumf %5, %6 : vector<512x128xf32>
    %c72 = arith.constant 72 : index
    %c0_5 = arith.constant 0 : index
    %8 = vector.load %arg2[%c72, %c0_5] : memref<344x128xf32, #tpu.memory_space<vmem>>, vector<128x128xf32>
    %c200 = arith.constant 200 : index
    %c0_6 = arith.constant 0 : index
    %9 = vector.load %arg2[%c200, %c0_6] : memref<344x128xf32, #tpu.memory_space<vmem>>, vector<1x128xf32>
    %cst_7 = arith.constant dense<0.000000e+00> : vector<512x128xf32>
    %10 = tpu.matmul %7, %8, %cst_7 {dimension_numbers = #tpu.dot_dimension_numbers<[1], [0], [0], [1], [0, 0, 1, 1], [], []>} : vector<512x128xf32>, vector<128x128xf32>, vector<512x128xf32> -> vector<512x128xf32>
    %11 = vector.broadcast %9 : vector<1x128xf32> to vector<512x128xf32>
    %12 = arith.addf %10, %11 : vector<512x128xf32>
    %cst_8 = arith.constant 0.000000e+00 : f32
    %13 = vector.broadcast %cst_8 : f32 to vector<512x128xf32>
    %14 = arith.maximumf %12, %13 : vector<512x128xf32>
    %c208 = arith.constant 208 : index
    %c0_9 = arith.constant 0 : index
    %15 = vector.load %arg2[%c208, %c0_9] : memref<344x128xf32, #tpu.memory_space<vmem>>, vector<128x128xf32>
    %c336 = arith.constant 336 : index
    %c0_10 = arith.constant 0 : index
    %16 = vector.load %arg2[%c336, %c0_10] : memref<344x128xf32, #tpu.memory_space<vmem>>, vector<1x128xf32>
    %cst_11 = arith.constant dense<0.000000e+00> : vector<512x128xf32>
    %17 = tpu.matmul %14, %15, %cst_11 {dimension_numbers = #tpu.dot_dimension_numbers<[1], [0], [0], [1], [0, 0, 1, 1], [], []>} : vector<512x128xf32>, vector<128x128xf32>, vector<512x128xf32> -> vector<512x128xf32>
    %18 = vector.broadcast %16 : vector<1x128xf32> to vector<512x128xf32>
    %19 = arith.addf %17, %18 : vector<512x128xf32>
    %20 = vector.extract_strided_slice %19 {offsets = [0, 0], sizes = [512, 72], strides = [1, 1]} : vector<512x128xf32> to vector<512x72xf32>
    %c0_12 = arith.constant 0 : index
    %c0_13 = arith.constant 0 : index
    %21 = vector.load %arg3[%c0_12, %c0_13] : memref<512x72xf32, #tpu.memory_space<vmem>>, vector<512x72xf32>
    tpu.vector_store %arg3[%c0_12, %c0_13], %20 {strides = array<i32>} : memref<512x72xf32, #tpu.memory_space<vmem>>, vector<512x72xf32>,
    return
  }
  func.func @transform_0(%arg0: i32) -> (i32, i32) {
    %c0_i32 = arith.constant 0 : i32
    %c0_i32_0 = arith.constant 0 : i32
    return %arg0, %c0_i32 : i32, i32
  }
  func.func @transform_1(%arg0: i32) -> (i32, i32) {
    %c0_i32 = arith.constant 0 : i32
    %c0_i32_0 = arith.constant 0 : i32
    %c0_i32_1 = arith.constant 0 : i32
    return %c0_i32, %c0_i32_0 : i32, i32
  }
  func.func @transform_2(%arg0: i32) -> (i32, i32) {
    %c0_i32 = arith.constant 0 : i32
    %c0_i32_0 = arith.constant 0 : i32
    return %arg0, %c0_i32 : i32, i32
  }
}

</mosaic_0001>

<bundles_post_ra>
// kernel: separate_mlp_forward.1
= control target key start
LH: loop header
LB: loop body
LE: loop exit
PB: predicated region body
PF: predicated region fallthrough
CT: control target
= control target key end

     0   :  { %s2660_s9 = smov 0   ;;  %s3367_s0 = inlined_call_operand.vmem [shape: f32[1024,64], index: 0, kind: input, shape index: {}]   ;;  %s3368_s1 = inlined_call_operand.vmem [shape: f32[344,128], index: 1, kind: input, shape index: {}]   ;;  %s3369_s2 = inlined_call_operand.vmem [shape: f32[1024,72], index: 2, kind: output, shape index: {}]  }
   0x1 LB: > { %s1863_s10 = sadd.s32 4294967295, %s2643_s9   ;;  %p1867_p0 = scmp.ge.s32.totalorder %s2643_s9, 1  ;;  %s2643_s9 = sphi %s2660_s9, %s12_s9  }
   0x2   : > { %p113_p1 = scmp.lt.s32.totalorder %s2643_s9, 3 }
   0x4   : > { %p114_p2 = pnand %p1867_p0, %p113_p1 }
   0x5   : > { %v211_v0 = vld [vmem:[%s3368_s1] sm:$0xff] (!%p114_p2)  ;;  %v212_v1 = vld [vmem:[%s3368_s1 + $0x8] sm:$0xff] (!%p114_p2)  ;;  %v213_v2 = vld [vmem:[%s3368_s1 + $0x10] sm:$0xff] (!%p114_p2)  ;;  %s1868_s17 = sshll.u32 (!%p114_p2), %s1863_s10, 6  ;;  %vm224_vm0 = vcmask (!%p114_p2), 523264   ;;  %vm1742_vm1 = vcmask (!%p114_p2), 588800  }
   0x6   : > { %117 = sbr.rel (%p114_p2) target bundleno = 800 (0x320), region = 28  ;;  %v2541_v3 = vpack.c.bf16 (!%p114_p2), %v212_v1, %v211_v0  ;;  %v214_v4 = vld [vmem:[%s3368_s1 + $0x18] sm:$0xff] (!%p114_p2)  ;;  %p136_p3 = scmp.lt.s32.totalorder (!%p114_p2), %s1868_s17, 127  ;;  %v215_v6 = vld [vmem:[%s3368_s1 + $0x20] sm:$0xff] (!%p114_p2)  ;;  %v216_v7 = vld [vmem:[%s3368_s1 + $0x28] sm:$0xff] (!%p114_p2) }
   0x7   : > { %v2545_v5 = vpack.c.bf16 (!%p114_p2), %v214_v4, %v213_v2  ;;  %v2549_v8 = vpack.c.bf16 (!%p114_p2), %v216_v7, %v215_v6  ;;  %v217_v9 = vld [vmem:[%s3368_s1 + $0x30] sm:$0xff] (!%p114_p2)  ;;  %v218_v10 = vld [vmem:[%s3368_s1 + $0x38] sm:$0xff] (!%p114_p2)  ;;  %v866_v13 = vld [vmem:[%s3368_s1 + $0x48] sm:$0xff] (!%p114_p2) }
   0x8   : > { %2542 = vmatprep.subr.bf16.mxu0 (!%p114_p2), %v2541_v3  ;;  %2621 = vmatprep.subr.bf16.mxu1 (!%p114_p2), %v2541_v3  ;;  %v2553_v12 = vpack.c.bf16 (!%p114_p2), %v218_v10, %v217_v9  ;;  %v867_v14 = vld [vmem:[%s3368_s1 + $0x50] sm:$0xff] (!%p114_p2)  ;;  %v868_v16 = vld [vmem:[%s3368_s1 + $0x58] sm:$0xff] (!%p114_p2)  ;;  %v869_v17 = vld [vmem:[%s3368_s1 + $0x60] sm:$0xff] (!%p114_p2) }
   0x9   : > { %2544 = vmatpush3.bf16.msra.mxu0 (!%p114_p2), %v2541_v3  ;;  %2625 = vmatpush3.bf16.msra.mxu1 (!%p114_p2), %v2541_v3  ;;  %v2557_v15 = vpack.c.bf16 (!%p114_p2), %v867_v14, %v866_v13  ;;  %v2561_v23 = vpack.c.bf16 (!%p114_p2), %v869_v17, %v868_v16  ;;  %v870_v24 = vld [vmem:[%s3368_s1 + $0x68] sm:$0xff] (!%p114_p2)  ;;  %v871_v25 = vld [vmem:[%s3368_s1 + $0x70] sm:$0xff] (!%p114_p2)  ;;  %v872_v31 = vld [vmem:[%s3368_s1 + $0x78] sm:$0xff] (!%p114_p2) }
   0xa   : > { %2546 = vmatprep.subr.bf16.mxu0 (!%p114_p2), %v2545_v5  ;;  %2622 = vmatprep.subr.bf16.mxu1 (!%p114_p2), %v2545_v5  ;;  %v2565_v30 = vpack.c.bf16 (!%p114_p2), %v871_v25, %v870_v24  ;;  %v873_v32 = vld [vmem:[%s3368_s1 + $0x80] sm:$0xff] (!%p114_p2)  ;;  %v874_v38 = vld [vmem:[%s3368_s1 + $0x88] sm:$0xff] (!%p114_p2)  ;;  %v875_v39 = vld [vmem:[%s3368_s1 + $0x90] sm:$0xff] (!%p114_p2) }
   0xb   : > { %v2569_v37 = vpack.c.bf16 (!%p114_p2), %v873_v32, %v872_v31  ;;  %v2573_v44 = vpack.c.bf16 (!%p114_p2), %v875_v39, %v874_v38  ;;  %v876_v45 = vld [vmem:[%s3368_s1 + $0x98] sm:$0xff] (!%p114_p2)  ;;  %v877_v46 = vld [vmem:[%s3368_s1 + $0xa0] sm:$0xff] (!%p114_p2)  ;;  %v878_v52 = vld [vmem:[%s3368_s1 + $0xa8] sm:$0xff] (!%p114_p2) }
   0xc   : > { %v2577_v51 = vpack.c.bf16 (!%p114_p2), %v877_v46, %v876_v45  ;;  %v879_v53 = vld [vmem:[%s3368_s1 + $0xb0] sm:$0xff] (!%p114_p2)  ;;  %v880_v59 = vld [vmem:[%s3368_s1 + $0xb8] sm:$0xff] (!%p114_p2)  ;;  %v881_v60 = vld [vmem:[%s3368_s1 + $0xc0] sm:$0xff] (!%p114_p2) }
   0xd   : > { %s3371_s17 = smov (!%p136_p3, %s1868_s17), 127  ;;  %2548 = vmatpush3.bf16.msra.mxu0 %v2545_v5  ;;  %2626 = vmatpush3.bf16.msra.mxu1 %v2545_v5  ;;  %v2581_v58 = vpack.c.bf16 %v879_v53, %v878_v52  ;;  %v2585_v1 = vpack.c.bf16 %v881_v60, %v880_v59  ;;  %v1337_v45 = vld [vmem:[%s3368_s1 + $0xd8] sm:$0xff]  ;;  %v1338_v46 = vld [vmem:[%s3368_s1 + $0xe0] sm:$0xff] }
   0xe   : > { %s1869_s24 = sshll.u32 %s3371_s17, 3  ;;  %2550 = vmatprep.subr.bf16.mxu0 %v2549_v8  ;;  %2623 = vmatprep.subr.bf16.mxu1 %v2549_v8 }
   0xf   : > { %s2700_s3 = scalar_lea.vmem %s3367_s0, %s1869_s24  ;;  %s3170_s29 = scalar_lea.vmem %s3369_s2, %s1869_s24 }
  0x10   : > { %v147_v11 = vld [vmem:[%s2700_s3] sm:$0xff]  ;;  %v148_v18 = vld [vmem:[%s2700_s3 + $0x8] sm:$0xff]  ;;  %v149_v19 = vld [vmem:[%s2700_s3 + $0x10] sm:$0xff] }
  0x11   : > { %2189 = vmatprep.mubr.msk.f32.mxu0 %vm224_vm0, %v147_v11  ;;  %2552 = vmatpush3.bf16.msra.mxu0 %v2549_v8  ;;  %v179_v20 = vld [vmem:[%s2700_s3 + $0x100] sm:$0xff]  ;;  %v180_v21 = vld [vmem:[%s2700_s3 + $0x108] sm:$0xff]  ;;  %v181_v22 = vld [vmem:[%s2700_s3 + $0x110] sm:$0xff] }
  0x12   : > { %2554 = vmatprep.subr.bf16.mxu0 %v2553_v12  ;;  %2627 = vmatpush3.bf16.msra.mxu1 %v2549_v8  ;;  %v150_v26 = vld [vmem:[%s2700_s3 + $0x18] sm:$0xff]  ;;  %v151_v27 = vld [vmem:[%s2700_s3 + $0x20] sm:$0xff]  ;;  %v152_v33 = vld [vmem:[%s2700_s3 + $0x28] sm:$0xff] }
  0x13   : > { %2624 = vmatprep.subr.bf16.mxu1 %v2553_v12  ;;  %2237 = vmatprep.mubr.msk.f32.mxu1 %vm224_vm0, %v179_v20  ;;  %v182_v28 = vld [vmem:[%s2700_s3 + $0x118] sm:$0xff]  ;;  %v183_v29 = vld [vmem:[%s2700_s3 + $0x120] sm:$0xff]  ;;  %v153_v34 = vld [vmem:[%s2700_s3 + $0x30] sm:$0xff] }
  0x14   : > { %v184_v35 = vld [vmem:[%s2700_s3 + $0x128] sm:$0xff]  ;;  %v185_v36 = vld [vmem:[%s2700_s3 + $0x130] sm:$0xff]  ;;  %v154_v40 = vld [vmem:[%s2700_s3 + $0x38] sm:$0xff] }
  0x15   : > { %2556 = vmatpush3.bf16.msra.mxu0 %v2553_v12  ;;  %v155_v41 = vld [vmem:[%s2700_s3 + $0x40] sm:$0xff]  ;;  %v186_v42 = vld [vmem:[%s2700_s3 + $0x138] sm:$0xff]  ;;  %v156_v47 = vld [vmem:[%s2700_s3 + $0x48] sm:$0xff] }
  0x16   : > { %2628 = vmatpush3.bf16.msra.mxu1 %v2553_v12  ;;  %v187_v43 = vld [vmem:[%s2700_s3 + $0x140] sm:$0xff]  ;;  %v157_v48 = vld [vmem:[%s2700_s3 + $0x50] sm:$0xff]  ;;  %v188_v49 = vld [vmem:[%s2700_s3 + $0x148] sm:$0xff] }
  0x17   : > { %2558 = vmatprep.subr.bf16.mxu1 %v2557_v15  ;;  %v189_v50 = vld [vmem:[%s2700_s3 + $0x150] sm:$0xff]  ;;  %v158_v54 = vld [vmem:[%s2700_s3 + $0x58] sm:$0xff]  ;;  %v159_v55 = vld [vmem:[%s2700_s3 + $0x60] sm:$0xff] }
  0x18   : > { %2190 = vmatmul.mubr.msk.f32.vlgmr.msra.gmra.mrb[0].mxu0 %vm224_vm0, %v148_v18  ;;  %v190_v56 = vld [vmem:[%s2700_s3 + $0x158] sm:$0xff]  ;;  %v191_v57 = vld [vmem:[%s2700_s3 + $0x160] sm:$0xff]  ;;  %v160_v61 = vld [vmem:[%s2700_s3 + $0x68] sm:$0xff] }
  0x19   : > { %2192 = vmatprep.mubr.msk.f32.mxu0 %vm224_vm0, %v149_v19  ;;  %2238 = vmatmul.mubr.msk.f32.vlgmr.msra.gmra.mrb[0].mxu1 %vm224_vm0, %v180_v21  ;;  %v161_v62 = vld [vmem:[%s2700_s3 + $0x70] sm:$0xff]  ;;  %v192_v63 = vld [vmem:[%s2700_s3 + $0x168] sm:$0xff]  ;;  %v162_v2 = vld [vmem:[%s2700_s3 + $0x78] sm:$0xff] }
  0x1a   : > { %2240 = vmatprep.mubr.msk.f32.mxu1 %vm224_vm0, %v181_v22  ;;  %2560 = vmatpush3.bf16.msra.mxu1 %v2557_v15  ;;  %v193_v0 = vld [vmem:[%s2700_s3 + $0x170] sm:$0xff]  ;;  %v163_v3 = vld [vmem:[%s2700_s3 + $0x80] sm:$0xff]  ;;  %v194_v4 = vld [vmem:[%s2700_s3 + $0x178] sm:$0xff] }
  0x1b   : > { %2562 = vmatprep.subr.bf16.mxu1 %v2561_v23  ;;  %v195_v5 = vld [vmem:[%s2700_s3 + $0x180] sm:$0xff]  ;;  %v164_v6 = vld [vmem:[%s2700_s3 + $0x88] sm:$0xff]  ;;  %v165_v7 = vld [vmem:[%s2700_s3 + $0x90] sm:$0xff] }
  0x1c   : > { %2193 = vmatmul.mubr.msk.f32.gmra.mrb[2].mxu0 %vm224_vm0, %v150_v26  ;;  %v196_v8 = vld [vmem:[%s2700_s3 + $0x188] sm:$0xff]  ;;  %v197_v9 = vld [vmem:[%s2700_s3 + $0x190] sm:$0xff]  ;;  %v166_v10 = vld [vmem:[%s2700_s3 + $0x98] sm:$0xff] }
  0x1d   : > { %2195 = vmatprep.mubr.msk.f32.mxu0 %vm224_vm0, %v151_v27  ;;  %2241 = vmatmul.mubr.msk.f32.gmra.mrb[2].mxu1 %vm224_vm0, %v182_v28  ;;  %v167_v11 = vld [vmem:[%s2700_s3 + $0xa0] sm:$0xff]  ;;  %v198_v12 = vld [vmem:[%s2700_s3 + $0x198] sm:$0xff]  ;;  %v168_v14 = vld [vmem:[%s2700_s3 + $0xa8] sm:$0xff] }
  0x1e   : > { %2243 = vmatprep.mubr.msk.f32.mxu1 %vm224_vm0, %v183_v29  ;;  %2564 = vmatpush3.bf16.msra.mxu1 %v2561_v23  ;;  %v199_v13 = vld [vmem:[%s2700_s3 + $0x1a0] sm:$0xff]  ;;  %v169_v15 = vld [vmem:[%s2700_s3 + $0xb0] sm:$0xff]  ;;  %v200_v16 = vld [vmem:[%s2700_s3 + $0x1a8] sm:$0xff] }
  0x1f   : > { %2566 = vmatprep.subr.bf16.mxu1 %v2565_v30  ;;  %v201_v17 = vld [vmem:[%s2700_s3 + $0x1b0] sm:$0xff]  ;;  %v170_v18 = vld [vmem:[%s2700_s3 + $0xb8] sm:$0xff]  ;;  %v171_v19 = vld [vmem:[%s2700_s3 + $0xc0] sm:$0xff] }
  0x20   : > { %2196 = vmatmul.mubr.msk.f32.gmra.mrb[4].mxu0 %vm224_vm0, %v152_v33  ;;  %v202_v20 = vld [vmem:[%s2700_s3 + $0x1b8] sm:$0xff]  ;;  %v203_v21 = vld [vmem:[%s2700_s3 + $0x1c0] sm:$0xff]  ;;  %v172_v22 = vld [vmem:[%s2700_s3 + $0xc8] sm:$0xff] }
  0x21   : > { %2198 = vmatprep.mubr.msk.f32.mxu0 %vm224_vm0, %v153_v34  ;;  %2244 = vmatmul.mubr.msk.f32.gmra.mrb[4].mxu1 %vm224_vm0, %v184_v35  ;;  %v173_v23 = vld [vmem:[%s2700_s3 + $0xd0] sm:$0xff]  ;;  %v204_v24 = vld [vmem:[%s2700_s3 + $0x1c8] sm:$0xff]  ;;  %v174_v26 = vld [vmem:[%s2700_s3 + $0xd8] sm:$0xff] }
  0x22   : > { %2246 = vmatprep.mubr.msk.f32.mxu1 %vm224_vm0, %v185_v36  ;;  %2568 = vmatpush3.bf16.msra.mxu1 %v2565_v30  ;;  %v205_v25 = vld [vmem:[%s2700_s3 + $0x1d0] sm:$0xff]  ;;  %v175_v27 = vld [vmem:[%s2700_s3 + $0xe0] sm:$0xff]  ;;  %v206_v28 = vld [vmem:[%s2700_s3 + $0x1d8] sm:$0xff] }
  0x23   : > { %2570 = vmatprep.subr.bf16.mxu1 %v2569_v37  ;;  %v207_v29 = vld [vmem:[%s2700_s3 + $0x1e0] sm:$0xff]  ;;  %v176_v30 = vld [vmem:[%s2700_s3 + $0xe8] sm:$0xff]  ;;  %v177_v31 = vld [vmem:[%s2700_s3 + $0xf0] sm:$0xff] }
  0x24   : > { %2199 = vmatmul.mubr.msk.f32.gmra.mrb[6].mxu0 %vm224_vm0, %v154_v40  ;;  %v208_v32 = vld [vmem:[%s2700_s3 + $0x1e8] sm:$0xff]  ;;  %v209_v33 = vld [vmem:[%s2700_s3 + $0x1f0] sm:$0xff]  ;;  %v178_v34 = vld [vmem:[%s2700_s3 + $0xf8] sm:$0xff] }
  0x25   : > { %2201 = vmatprep.mubr.msk.f32.mxu0 %vm224_vm0, %v155_v41  ;;  %2247 = vmatmul.mubr.msk.f32.gmra.mrb[6].mxu1 %vm224_vm0, %v186_v42  ;;  %v210_v35 = vld [vmem:[%s2700_s3 + $0x1f8] sm:$0xff]  ;;  %v2881_v36 = vld [vmem:[%s3368_s1 + $0x40] ss:$0 sm:$0xff] }
  0x26   : > { %2249 = vmatprep.mubr.msk.f32.mxu1 %vm224_vm0, %v187_v43  ;;  %2572 = vmatpush3.bf16.msra.mxu1 %v2569_v37 }
  0x27   : > { %2574 = vmatprep.subr.bf16.mxu1 %v2573_v44 }
  0x28   : > { %2202 = vmatmul.mubr.msk.f32.gmra.mrb[8].mxu0 %vm224_vm0, %v156_v47 }
  0x29   : > { %2204 = vmatprep.mubr.msk.f32.mxu0 %vm224_vm0, %v157_v48  ;;  %2250 = vmatmul.mubr.msk.f32.gmra.mrb[8].mxu1 %vm224_vm0, %v188_v49 }
  0x2a   : > { %2252 = vmatprep.mubr.msk.f32.mxu1 %vm224_vm0, %v189_v50  ;;  %2576 = vmatpush3.bf16.msra.mxu1 %v2573_v44  ;;  %v1336_v44 = vld [vmem:[%s3368_s1 + $0xd0] sm:$0xff]  ;;  %v1339_v50 = vld [vmem:[%s3368_s1 + $0xe8] sm:$0xff] }
  0x2b   : > { %2578 = vmatprep.subr.bf16.mxu1 %v2577_v51  ;;  %v2589_v49 = vpack.c.bf16 %v1337_v45, %v1336_v44 }
  0x2c   : > { %2205 = vmatmul.mubr.msk.f32.gmra.mrb[10].mxu0 %vm224_vm0, %v158_v54 }
  0x2d   : > { %2207 = vmatprep.mubr.msk.f32.mxu0 %vm224_vm0, %v159_v55  ;;  %2253 = vmatmul.mubr.msk.f32.gmra.mrb[10].mxu1 %vm224_vm0, %v190_v56  ;;  %v2593_v55 = vpack.c.bf16 %v1339_v50, %v1338_v46  ;;  %v1340_v56 = vld [vmem:[%s3368_s1 + $0xf0] sm:$0xff] }
  0x2e   : > { %2255 = vmatprep.mubr.msk.f32.mxu1 %vm224_vm0, %v191_v57  ;;  %2580 = vmatpush3.bf16.msra.mxu1 %v2577_v51  ;;  %v1341_v57 = vld [vmem:[%s3368_s1 + $0xf8] sm:$0xff] }
  0x2f   : > { %2582 = vmatprep.subr.bf16.mxu1 %v2581_v58  ;;  %2590 = vmatprep.subr.bf16.mxu0 %v2589_v49 }
  0x30   : > { %2208 = vmatmul.mubr.msk.f32.gmra.mrb[12].mxu0 %vm224_vm0, %v160_v61 }
  0x31   : > { %2210 = vmatprep.mubr.msk.f32.mxu0 %vm224_vm0, %v161_v62  ;;  %2256 = vmatmul.mubr.msk.f32.gmra.mrb[12].mxu1 %vm224_vm0, %v192_v63 }
  0x32   : > { %2258 = vmatprep.mubr.msk.f32.mxu1 %vm224_vm0, %v193_v0  ;;  %2584 = vmatpush3.bf16.msra.mxu1 %v2581_v58  ;;  %v2597_v0 = vpack.c.bf16 %v1341_v57, %v1340_v56 }
  0x33   : > { %2586 = vmatprep.subr.bf16.mxu1 %v2585_v1  ;;  %2592 = vmatpush3.bf16.msra.mxu0 %v2589_v49 }
  0x34   : > { %2211 = vmatmul.mubr.msk.f32.gmra.mrb[14].mxu0 %vm224_vm0, %v162_v2  ;;  %2594 = vmatprep.subr.bf16.mxu0 %v2593_v55 }
  0x35   : > { %2213 = vmatprep.mubr.msk.f32.mxu0 %vm224_vm0, %v163_v3  ;;  %2259 = vmatmul.mubr.msk.f32.gmra.mrb[14].mxu1 %vm224_vm0, %v194_v4 }
  0x36   : > { %2261 = vmatprep.mubr.msk.f32.mxu1 %vm224_vm0, %v195_v5  ;;  %2588 = vmatpush3.bf16.msra.mxu1 %v2585_v1  ;;  %v1342_v5 = vld [vmem:[%s3368_s1 + $0x100] sm:$0xff] }
  0x37   : > { %2596 = vmatpush3.bf16.msra.mxu0 %v2593_v55 }
  0x38   : > { %2214 = vmatmul.mubr.msk.f32.gmra.mrb[16].mxu0 %vm224_vm0, %v164_v6  ;;  %v1343_v6 = vld [vmem:[%s3368_s1 + $0x108] sm:$0xff]  ;;  %2598 = vmatprep.subr.bf16.mxu0 %v2597_v0 }
  0x39   : > { %2216 = vmatprep.mubr.msk.f32.mxu0 %vm224_vm0, %v165_v7  ;;  %2262 = vmatmul.mubr.msk.f32.gmra.mrb[16].mxu1 %vm224_vm0, %v196_v8 }
  0x3a   : > { %2264 = vmatprep.mubr.msk.f32.mxu1 %vm224_vm0, %v197_v9 }
  0x3b   : > { %2600 = vmatpush3.bf16.msra.mxu0 %v2597_v0 }
  0x3c   : > { %2217 = vmatmul.mubr.msk.f32.gmra.mrb[18].mxu0 %vm224_vm0, %v166_v10 }
  0x3d   : > { %2219 = vmatprep.mubr.msk.f32.mxu0 %vm224_vm0, %v167_v11  ;;  %2265 = vmatmul.mubr.msk.f32.gmra.mrb[18].mxu1 %vm224_vm0, %v198_v12 }
  0x3e   : > { %2267 = vmatprep.mubr.msk.f32.mxu1 %vm224_vm0, %v199_v13  ;;  %v2601_v13 = vpack.c.bf16 %v1343_v6, %v1342_v5 }
  0x40   : > { %2220 = vmatmul.mubr.msk.f32.gmra.mrb[20].mxu0 %vm224_vm0, %v168_v14  ;;  %2602 = vmatprep.subr.bf16.mxu0 %v2601_v13 }
  0x41   : > { %2222 = vmatprep.mubr.msk.f32.mxu0 %vm224_vm0, %v169_v15  ;;  %2268 = vmatmul.mubr.msk.f32.gmra.mrb[20].mxu1 %vm224_vm0, %v200_v16 }
  0x42   : > { %2270 = vmatprep.mubr.msk.f32.mxu1 %vm224_vm0, %v201_v17  ;;  %2604 = vmatpush3.bf16.msra.mxu0 %v2601_v13 }
  0x44   : > { %2223 = vmatmul.mubr.msk.f32.gmra.mrb[22].mxu0 %vm224_vm0, %v170_v18  ;;  %v1344_v18 = vld [vmem:[%s3368_s1 + $0x110] sm:$0xff] }
  0x45   : > { %2225 = vmatprep.mubr.msk.f32.mxu0 %vm224_vm0, %v171_v19  ;;  %2271 = vmatmul.mubr.msk.f32.gmra.mrb[22].mxu1 %vm224_vm0, %v202_v20  ;;  %v1345_v19 = vld [vmem:[%s3368_s1 + $0x118] sm:$0xff] }
  0x46   : > { %2273 = vmatprep.mubr.msk.f32.mxu1 %vm224_vm0, %v203_v21 }
  0x48   : > { %2226 = vmatmul.mubr.msk.f32.gmra.mrb[24].mxu0 %vm224_vm0, %v172_v22 }
  0x49   : > { %2228 = vmatprep.mubr.msk.f32.mxu0 %vm224_vm0, %v173_v23  ;;  %2274 = vmatmul.mubr.msk.f32.gmra.mrb[24].mxu1 %vm224_vm0, %v204_v24 }
  0x4a   : > { %2276 = vmatprep.mubr.msk.f32.mxu1 %vm224_vm0, %v205_v25 }
  0x4c   : > { %2229 = vmatmul.mubr.msk.f32.gmra.mrb[26].mxu0 %vm224_vm0, %v174_v26  ;;  %v2605_v26 = vpack.c.bf16 %v1345_v19, %v1344_v18 }
  0x4d   : > { %2231 = vmatprep.mubr.msk.f32.mxu0 %vm224_vm0, %v175_v27  ;;  %2277 = vmatmul.mubr.msk.f32.gmra.mrb[26].mxu1 %vm224_vm0, %v206_v28 }
  0x4e   : > { %2279 = vmatprep.mubr.msk.f32.mxu1 %vm224_vm0, %v207_v29  ;;  %2606 = vmatprep.subr.bf16.mxu0 %v2605_v26 }
  0x4f   : > { %2608 = vmatpush3.bf16.msra.mxu0 %v2605_v26 }
  0x50   : > { %2232 = vmatmul.mubr.msk.f32.gmra.mrb[28].mxu0 %vm224_vm0, %v176_v30 }
  0x51   : > { %2234 = vmatprep.mubr.msk.f32.mxu0 %vm224_vm0, %v177_v31  ;;  %2280 = vmatmul.mubr.msk.f32.gmra.mrb[28].mxu1 %vm224_vm0, %v208_v32  ;;  %v1346_v31 = vld [vmem:[%s3368_s1 + $0x120] sm:$0xff]  ;;  %v1347_v32 = vld [vmem:[%s3368_s1 + $0x128] sm:$0xff] }
  0x52   : > { %2282 = vmatprep.mubr.msk.f32.mxu1 %vm224_vm0, %v209_v33 }
  0x54   : > { %2235 = vmatmul.mubr.msk.f32.gmra.mrb[30].mxu0 %vm224_vm0, %v178_v34 }
  0x55   : > { %2283 = vmatmul.mubr.msk.f32.gmra.mrb[30].mxu1 %vm224_vm0, %v210_v35 }
  0xeb   : > { %v2191_v37 = vpop.f32.mrb[0].mxu0 }
  0xec   : > { %v489_v38 = vadd.f32 %v2191_v37, %v2881_v36  ;;  %v483_v39 = vpop.f32.mrb[1].mxu0  ;;  %v2239_v40 = vpop.f32.mrb[0].mxu1 }
  0xed   : > { %v484_v41 = vadd.f32 %v2881_v36, %v483_v39  ;;  %v2886_v42 = vadd.f32 %v2239_v40, %v2881_v36  ;;  %v2888_v43 = vpop.f32.mrb[1].mxu1  ;;  %v2609_v40 = vpack.c.bf16 %v1347_v32, %v1346_v31 }
  0xee   : > { %v803_v51 = vmax.f32 %v489_v38, 0.0 }
  0xef   : > { %v802_v47 = vmax.f32 %v484_v41, 0.0  ;;  %v2194_v48 = vpop.f32.mrb[2].mxu0  ;;  %2610 = vmatprep.subr.bf16.mxu0 %v2609_v40 }
  0xf0   : > { %v499_v52 = vadd.f32 %v2194_v48, %v2881_v36  ;;  %v493_v53 = vpop.f32.mrb[3].mxu0  ;;  %v2242_v54 = vpop.f32.mrb[2].mxu1  ;;  %v1349_v48 = vld [vmem:[%s3368_s1 + $0x138] sm:$0xff]  ;;  %2612 = vmatpush3.bf16.msra.mxu0 %v2609_v40 }
  0xf1   : > { %v494_v58 = vadd.f32 %v2881_v36, %v493_v53  ;;  %2317 = vmatprep.mubr.f32.mxu1 %v802_v47  ;;  %v2911_v59 = vadd.f32 %v2242_v54, %v2881_v36  ;;  %v653_v60 = vpop.f32.mrb[3].mxu1  ;;  %v1348_v47 = vld [vmem:[%s3368_s1 + $0x130] sm:$0xff] }
  0xf2   : > { %2318 = vmatmul.mubr.f32.vlgmr.msra.gmra.mrb[32].mxu1 %v803_v51  ;;  %v2914_v61 = vadd.f32 %v2881_v36, %v653_v60  ;;  %v805_v1 = vmax.f32 %v499_v52, 0.0  ;;  %v2613_v55 = vpack.c.bf16 %v1349_v48, %v1348_v47 }
  0xf3   : > { %v804_v62 = vmax.f32 %v494_v58, 0.0  ;;  %v2197_v63 = vpop.f32.mrb[4].mxu0 }
  0xf4   : > { %v509_v2 = vadd.f32 %v2197_v63, %v2881_v36  ;;  %v503_v3 = vpop.f32.mrb[5].mxu0  ;;  %v2245_v4 = vpop.f32.mrb[4].mxu1  ;;  %v1351_v63 = vld [vmem:[%s3368_s1 + $0x148] sm:$0xff]  ;;  %2614 = vmatprep.subr.bf16.mxu0 %v2613_v55 }
  0xf5   : > { %v504_v7 = vadd.f32 %v2881_v36, %v503_v3  ;;  %2320 = vmatprep.mubr.f32.mxu1 %v804_v62  ;;  %v2925_v8 = vadd.f32 %v2245_v4, %v2881_v36  ;;  %v663_v9 = vpop.f32.mrb[5].mxu1  ;;  %v1350_v62 = vld [vmem:[%s3368_s1 + $0x140] sm:$0xff]  ;;  %2616 = vmatpush3.bf16.msra.mxu0 %v2613_v55 }
  0xf6   : > { %2321 = vmatmul.mubr.f32.gmra.mrb[34].mxu1 %v805_v1  ;;  %v2928_v10 = vadd.f32 %v2881_v36, %v663_v9  ;;  %v807_v14 = vmax.f32 %v509_v2, 0.0  ;;  %v2617_v6 = vpack.c.bf16 %v1351_v63, %v1350_v62 }
  0xf7   : > { %v806_v11 = vmax.f32 %v504_v7, 0.0  ;;  %v2200_v12 = vpop.f32.mrb[6].mxu0 }
  0xf8   : > { %v519_v15 = vadd.f32 %v2200_v12, %v2881_v36  ;;  %v513_v16 = vpop.f32.mrb[7].mxu0  ;;  %v2248_v17 = vpop.f32.mrb[6].mxu1  ;;  %2618 = vmatprep.subr.bf16.mxu0 %v2617_v6 }
  0xf9   : > { %v514_v20 = vadd.f32 %v2881_v36, %v513_v16  ;;  %2323 = vmatprep.mubr.f32.mxu1 %v806_v11  ;;  %v2939_v21 = vadd.f32 %v2248_v17, %v2881_v36  ;;  %v673_v22 = vpop.f32.mrb[7].mxu1  ;;  %2620 = vmatpush3.bf16.msra.mxu0 %v2617_v6 }
  0xfa   : > { %2324 = vmatmul.mubr.f32.gmra.mrb[36].mxu1 %v807_v14  ;;  %v2942_v23 = vadd.f32 %v2881_v36, %v673_v22  ;;  %v809_v27 = vmax.f32 %v519_v15, 0.0 }
  0xfb   : > { %v808_v24 = vmax.f32 %v514_v20, 0.0  ;;  %v2203_v25 = vpop.f32.mrb[8].mxu0 }
  0xfc   : > { %v529_v28 = vadd.f32 %v2203_v25, %v2881_v36  ;;  %v523_v29 = vpop.f32.mrb[9].mxu0  ;;  %v2251_v30 = vpop.f32.mrb[8].mxu1 }
  0xfd   : > { %v524_v33 = vadd.f32 %v2881_v36, %v523_v29  ;;  %2326 = vmatprep.mubr.f32.mxu1 %v808_v24  ;;  %v2953_v34 = vadd.f32 %v2251_v30, %v2881_v36  ;;  %v683_v35 = vpop.f32.mrb[9].mxu1 }
  0xfe   : > { %2327 = vmatmul.mubr.f32.gmra.mrb[38].mxu1 %v809_v27  ;;  %v2956_v37 = vadd.f32 %v2881_v36, %v683_v35  ;;  %v811_v41 = vmax.f32 %v529_v28, 0.0 }
  0xff   : > { %v810_v38 = vmax.f32 %v524_v33, 0.0  ;;  %v2206_v39 = vpop.f32.mrb[10].mxu0 }
 0x100   : > { %v539_v44 = vadd.f32 %v2206_v39, %v2881_v36  ;;  %v533_v45 = vpop.f32.mrb[11].mxu0  ;;  %v2254_v46 = vpop.f32.mrb[10].mxu1 }
 0x101   : > { %v534_v49 = vadd.f32 %v2881_v36, %v533_v45  ;;  %2329 = vmatprep.mubr.f32.mxu1 %v810_v38  ;;  %v2967_v50 = vadd.f32 %v2254_v46, %v2881_v36  ;;  %v693_v51 = vpop.f32.mrb[11].mxu1 }
 0x102   : > { %2330 = vmatmul.mubr.f32.gmra.mrb[40].mxu1 %v811_v41  ;;  %v2970_v52 = vadd.f32 %v2881_v36, %v693_v51  ;;  %v813_v56 = vmax.f32 %v539_v44, 0.0 }
 0x103   : > { %v812_v53 = vmax.f32 %v534_v49, 0.0  ;;  %v2209_v54 = vpop.f32.mrb[12].mxu0 }
 0x104   : > { %v549_v57 = vadd.f32 %v2209_v54, %v2881_v36  ;;  %v543_v58 = vpop.f32.mrb[13].mxu0  ;;  %v2257_v60 = vpop.f32.mrb[12].mxu1 }
 0x105   : > { %v544_v0 = vadd.f32 %v2881_v36, %v543_v58  ;;  %2332 = vmatprep.mubr.f32.mxu1 %v812_v53  ;;  %v2981_v1 = vadd.f32 %v2257_v60, %v2881_v36  ;;  %v703_v2 = vpop.f32.mrb[13].mxu1 }
 0x106   : > { %2333 = vmatmul.mubr.f32.gmra.mrb[42].mxu1 %v813_v56  ;;  %v2984_v3 = vadd.f32 %v2881_v36, %v703_v2  ;;  %v815_v7 = vmax.f32 %v549_v57, 0.0 }
 0x107   : > { %v814_v4 = vmax.f32 %v544_v0, 0.0  ;;  %v2212_v5 = vpop.f32.mrb[14].mxu0 }
 0x108   : > { %v559_v9 = vadd.f32 %v2212_v5, %v2881_v36  ;;  %v553_v11 = vpop.f32.mrb[15].mxu0  ;;  %v2260_v12 = vpop.f32.mrb[14].mxu1 }
 0x109   : > { %v554_v13 = vadd.f32 %v2881_v36, %v553_v11  ;;  %2335 = vmatprep.mubr.f32.mxu1 %v814_v4  ;;  %v2989_v14 = vadd.f32 %v2260_v12, %v2881_v36  ;;  %v713_v15 = vpop.f32.mrb[15].mxu1 }
 0x10a   : > { %2336 = vmatmul.mubr.f32.gmra.mrb[44].mxu1 %v815_v7  ;;  %v2992_v16 = vadd.f32 %v2881_v36, %v713_v15  ;;  %v817_v19 = vmax.f32 %v559_v9, 0.0 }
 0x10b   : > { %v816_v17 = vmax.f32 %v554_v13, 0.0  ;;  %v2215_v18 = vpop.f32.mrb[16].mxu0 }
 0x10c   : > { %v569_v20 = vadd.f32 %v2215_v18, %v2881_v36  ;;  %v563_v22 = vpop.f32.mrb[17].mxu0  ;;  %v2263_v24 = vpop.f32.mrb[16].mxu1 }
 0x10d   : > { %v564_v25 = vadd.f32 %v2881_v36, %v563_v22  ;;  %2338 = vmatprep.mubr.f32.mxu1 %v816_v17  ;;  %v2997_v26 = vadd.f32 %v2263_v24, %v2881_v36  ;;  %v723_v27 = vpop.f32.mrb[17].mxu1 }
 0x10e   : > { %2339 = vmatmul.mubr.f32.gmra.mrb[46].mxu1 %v817_v19  ;;  %v3000_v28 = vadd.f32 %v2881_v36, %v723_v27  ;;  %v819_v31 = vmax.f32 %v569_v20, 0.0 }
 0x10f   : > { %v818_v29 = vmax.f32 %v564_v25, 0.0  ;;  %v2218_v30 = vpop.f32.mrb[18].mxu0 }
 0x110   : > { %v579_v32 = vadd.f32 %v2218_v30, %v2881_v36  ;;  %v573_v33 = vpop.f32.mrb[19].mxu0  ;;  %v2266_v35 = vpop.f32.mrb[18].mxu1 }
 0x111   : > { %v574_v38 = vadd.f32 %v2881_v36, %v573_v33  ;;  %2341 = vmatprep.mubr.f32.mxu1 %v818_v29  ;;  %v3005_v39 = vadd.f32 %v2266_v35, %v2881_v36  ;;  %v733_v40 = vpop.f32.mrb[19].mxu1 }
 0x112   : > { %2342 = vmatmul.mubr.f32.gmra.mrb[48].mxu1 %v819_v31  ;;  %v3008_v41 = vadd.f32 %v2881_v36, %v733_v40  ;;  %v821_v46 = vmax.f32 %v579_v32, 0.0 }
 0x113   : > { %v820_v44 = vmax.f32 %v574_v38, 0.0  ;;  %v2221_v45 = vpop.f32.mrb[20].mxu0 }
 0x114   : > { %v589_v47 = vadd.f32 %v2221_v45, %v2881_v36  ;;  %v583_v48 = vpop.f32.mrb[21].mxu0  ;;  %v2269_v49 = vpop.f32.mrb[20].mxu1 }
 0x115   : > { %v584_v51 = vadd.f32 %v2881_v36, %v583_v48  ;;  %2344 = vmatprep.mubr.f32.mxu1 %v820_v44  ;;  %v3013_v53 = vadd.f32 %v2269_v49, %v2881_v36  ;;  %v743_v54 = vpop.f32.mrb[21].mxu1 }
 0x116   : > { %2345 = vmatmul.mubr.f32.gmra.mrb[50].mxu1 %v821_v46  ;;  %v3016_v55 = vadd.f32 %v2881_v36, %v743_v54  ;;  %v823_v58 = vmax.f32 %v589_v47, 0.0 }
 0x117   : > { %v822_v56 = vmax.f32 %v584_v51, 0.0  ;;  %v2224_v57 = vpop.f32.mrb[22].mxu0 }
 0x118   : > { %v599_v60 = vadd.f32 %v2224_v57, %v2881_v36  ;;  %v593_v62 = vpop.f32.mrb[23].mxu0  ;;  %v2272_v63 = vpop.f32.mrb[22].mxu1  ;;  %v644_v57 = vadd.f32 %v2881_v36, %v2888_v43  ;;  %v836_v43 = vmax.f32 %v2914_v61, 0.0  ;;  %v841_v61 = vmax.f32 %v2939_v21, 0.0 }
 0x119   : > { %v594_v0 = vadd.f32 %v2881_v36, %v593_v62  ;;  %2347 = vmatprep.mubr.f32.mxu1 %v822_v56  ;;  %v3021_v2 = vadd.f32 %v2272_v63, %v2881_v36  ;;  %v753_v4 = vpop.f32.mrb[23].mxu1  ;;  %v850_v21 = vmax.f32 %v3000_v28, 0.0  ;;  %v855_v28 = vmax.f32 %v3013_v53, 0.0 }
 0x11a   : > { %2348 = vmatmul.mubr.f32.gmra.mrb[52].mxu1 %v823_v58  ;;  %v3024_v5 = vadd.f32 %v2881_v36, %v753_v4  ;;  %v825_v9 = vmax.f32 %v599_v60, 0.0 }
 0x11b   : > { %v824_v6 = vmax.f32 %v594_v0, 0.0  ;;  %v2227_v7 = vpop.f32.mrb[24].mxu0 }
 0x11c   : > { %v609_v11 = vadd.f32 %v2227_v7, %v2881_v36  ;;  %v603_v12 = vpop.f32.mrb[25].mxu0  ;;  %v2275_v13 = vpop.f32.mrb[24].mxu1 }
 0x11d   : > { %v604_v15 = vadd.f32 %v2881_v36, %v603_v12  ;;  %2350 = vmatprep.mubr.f32.mxu1 %v824_v6  ;;  %v3029_v17 = vadd.f32 %v2275_v13, %v2881_v36  ;;  %v763_v18 = vpop.f32.mrb[25].mxu1  ;;  %v835_v13 = vmax.f32 %v2886_v42, 0.0  ;;  %v844_v42 = vmax.f32 %v2970_v52, 0.0 }
 0x11e   : > { %2351 = vmatmul.mubr.f32.gmra.mrb[54].mxu1 %v825_v9  ;;  %v3032_v19 = vadd.f32 %v2881_v36, %v763_v18  ;;  %v827_v24 = vmax.f32 %v609_v11, 0.0  ;;  %v834_v11 = vmax.f32 %v644_v57, 0.0  ;;  %v837_v18 = vmax.f32 %v2911_v59, 0.0 }
 0x11f   : > { %v826_v20 = vmax.f32 %v604_v15, 0.0  ;;  %v2230_v22 = vpop.f32.mrb[26].mxu0  ;;  %v838_v15 = vmax.f32 %v2928_v10, 0.0  ;;  %v843_v10 = vmax.f32 %v2953_v34, 0.0  ;;  %v846_v59 = vmax.f32 %v2984_v3, 0.0 }
 0x120   : > { %v619_v25 = vadd.f32 %v2230_v22, %v2881_v36  ;;  %v613_v27 = vpop.f32.mrb[27].mxu0  ;;  %v2278_v29 = vpop.f32.mrb[26].mxu1  ;;  %v842_v22 = vmax.f32 %v2956_v37, 0.0  ;;  %v847_v37 = vmax.f32 %v2981_v1, 0.0  ;;  %v849_v52 = vmax.f32 %v2989_v14, 0.0 }
 0x121   : > { %v614_v30 = vadd.f32 %v2881_v36, %v613_v27  ;;  %2353 = vmatprep.mubr.f32.mxu1 %v826_v20  ;;  %v3037_v31 = vadd.f32 %v2278_v29, %v2881_v36  ;;  %v773_v32 = vpop.f32.mrb[27].mxu1  ;;  %v839_v20 = vmax.f32 %v2925_v8, 0.0  ;;  %v848_v8 = vmax.f32 %v2992_v16, 0.0 }
 0x122   : > { %2354 = vmatmul.mubr.f32.gmra.mrb[56].mxu1 %v827_v24  ;;  %v3040_v33 = vadd.f32 %v2881_v36, %v773_v32  ;;  %v829_v40 = vmax.f32 %v619_v25, 0.0  ;;  %v852_v34 = vmax.f32 %v3008_v41, 0.0  ;;  %v851_v3 = vmax.f32 %v2997_v26, 0.0 }
 0x123   : > { %v828_v35 = vmax.f32 %v614_v30, 0.0  ;;  %v2233_v38 = vpop.f32.mrb[28].mxu0  ;;  %v853_v16 = vmax.f32 %v3005_v39, 0.0  ;;  %v856_v1 = vmax.f32 %v3024_v5, 0.0  ;;  %v858_v14 = vmax.f32 %v3032_v19, 0.0 }
 0x124   : > { %v629_v44 = vadd.f32 %v2233_v38, %v2881_v36  ;;  %v623_v45 = vpop.f32.mrb[29].mxu0  ;;  %v2281_v46 = vpop.f32.mrb[28].mxu1  ;;  %v857_v41 = vmax.f32 %v3021_v2, 0.0  ;;  %v860_v26 = vmax.f32 %v3040_v33, 0.0  ;;  %v861_v5 = vmax.f32 %v3037_v31, 0.0 }
 0x125   : > { %v624_v47 = vadd.f32 %v2881_v36, %v623_v45  ;;  %2356 = vmatprep.mubr.f32.mxu1 %v828_v35  ;;  %v3045_v48 = vadd.f32 %v2281_v46, %v2881_v36  ;;  %v783_v49 = vpop.f32.mrb[29].mxu1 }
 0x126   : > { %2357 = vmatmul.mubr.f32.gmra.mrb[58].mxu1 %v829_v40  ;;  %v3048_v51 = vadd.f32 %v2881_v36, %v783_v49  ;;  %v831_v58 = vmax.f32 %v629_v44, 0.0 }
 0x127   : > { %v830_v54 = vmax.f32 %v624_v47, 0.0  ;;  %v2236_v56 = vpop.f32.mrb[30].mxu0  ;;  %v863_v19 = vmax.f32 %v3045_v48, 0.0 }
 0x128   : > { %v639_v60 = vadd.f32 %v2236_v56, %v2881_v36  ;;  %v633_v62 = vpop.f32.mrb[31].mxu0  ;;  %v2284_v63 = vpop.f32.mrb[30].mxu1  ;;  %v862_v39 = vmax.f32 %v3048_v51, 0.0 }
 0x129   : > { %v634_v0 = vadd.f32 %v2881_v36, %v633_v62  ;;  %2359 = vmatprep.mubr.f32.mxu1 %v830_v54  ;;  %v3055_v4 = vadd.f32 %v2284_v63, %v2881_v36  ;;  %v793_v6 = vpop.f32.mrb[31].mxu1 }
 0x12a   : > { %2360 = vmatmul.mubr.f32.gmra.mrb[60].mxu1 %v831_v58  ;;  %v3058_v7 = vadd.f32 %v2881_v36, %v793_v6  ;;  %v833_v12 = vmax.f32 %v639_v60, 0.0  ;;  %v840_v36 = vmax.f32 %v2942_v23, 0.0  ;;  %v845_v23 = vmax.f32 %v2967_v50, 0.0 }
 0x12b   : > { %v832_v9 = vmax.f32 %v634_v0, 0.0  ;;  %v854_v50 = vmax.f32 %v3016_v55, 0.0  ;;  %v859_v55 = vmax.f32 %v3029_v17, 0.0  ;;  %v865_v2 = vmax.f32 %v3055_v4, 0.0  ;;  %v3094_v17 = vld [vmem:[%s3368_s1 + $0xc8] ss:$0 sm:$0xff] }
 0x12c   : > { %v864_v53 = vmax.f32 %v3058_v7, 0.0 }
 0x12d   : > { %2362 = vmatprep.mubr.f32.mxu1 %v832_v9 }
 0x12e   : > { %2363 = vmatmul.mubr.f32.gmra.mrb[62].mxu1 %v833_v12 }
 0x12f   : > { %2365 = vmatprep.mubr.f32.mxu1 %v834_v11 }
 0x132   : > { %2366 = vmatmul.mubr.f32.gmra.mrb[64].mxu1 %v835_v13 }
 0x133   : > { %2368 = vmatprep.mubr.f32.mxu1 %v836_v43 }
 0x136   : > { %2369 = vmatmul.mubr.f32.gmra.mrb[66].mxu1 %v837_v18 }
 0x137   : > { %2371 = vmatprep.mubr.f32.mxu1 %v838_v15 }
 0x13a   : > { %2372 = vmatmul.mubr.f32.gmra.mrb[68].mxu1 %v839_v20 }
 0x13b   : > { %2374 = vmatprep.mubr.f32.mxu1 %v840_v36 }
 0x13e   : > { %2375 = vmatmul.mubr.f32.gmra.mrb[70].mxu1 %v841_v61 }
 0x13f   : > { %2377 = vmatprep.mubr.f32.mxu1 %v842_v22 }
 0x142   : > { %2378 = vmatmul.mubr.f32.gmra.mrb[72].mxu1 %v843_v10 }
 0x143   : > { %2380 = vmatprep.mubr.f32.mxu1 %v844_v42 }
 0x146   : > { %2381 = vmatmul.mubr.f32.gmra.mrb[74].mxu1 %v845_v23 }
 0x147   : > { %2383 = vmatprep.mubr.f32.mxu1 %v846_v59 }
 0x14a   : > { %2384 = vmatmul.mubr.f32.gmra.mrb[76].mxu1 %v847_v37 }
 0x14b   : > { %2386 = vmatprep.mubr.f32.mxu1 %v848_v8 }
 0x14e   : > { %2387 = vmatmul.mubr.f32.gmra.mrb[78].mxu1 %v849_v52 }
 0x14f   : > { %2389 = vmatprep.mubr.f32.mxu1 %v850_v21 }
 0x152   : > { %2390 = vmatmul.mubr.f32.gmra.mrb[80].mxu1 %v851_v3 }
 0x153   : > { %2392 = vmatprep.mubr.f32.mxu1 %v852_v34 }
 0x156   : > { %2393 = vmatmul.mubr.f32.gmra.mrb[82].mxu1 %v853_v16 }
 0x157   : > { %2395 = vmatprep.mubr.f32.mxu1 %v854_v50 }
 0x15a   : > { %2396 = vmatmul.mubr.f32.gmra.mrb[84].mxu1 %v855_v28 }
 0x15b   : > { %2398 = vmatprep.mubr.f32.mxu1 %v856_v1 }
 0x15e   : > { %2399 = vmatmul.mubr.f32.gmra.mrb[86].mxu1 %v857_v41 }
 0x15f   : > { %2401 = vmatprep.mubr.f32.mxu1 %v858_v14 }
 0x162   : > { %2402 = vmatmul.mubr.f32.gmra.mrb[88].mxu1 %v859_v55 }
 0x163   : > { %2404 = vmatprep.mubr.f32.mxu1 %v860_v26 }
 0x166   : > { %2405 = vmatmul.mubr.f32.gmra.mrb[90].mxu1 %v861_v5 }
 0x167   : > { %2407 = vmatprep.mubr.f32.mxu1 %v862_v39 }
 0x16a   : > { %2408 = vmatmul.mubr.f32.gmra.mrb[92].mxu1 %v863_v19 }
 0x16b   : > { %2410 = vmatprep.mubr.f32.mxu1 %v864_v53 }
 0x16e   : > { %2411 = vmatmul.mubr.f32.gmra.mrb[94].mxu1 %v865_v2 }
 0x1c5   : > { %v2319_v24 = vpop.f32.mrb[32].mxu1 }
 0x1c6   : > { %v959_v25 = vadd.f32 %v2319_v24, %v3094_v17  ;;  %v953_v27 = vpop.f32.mrb[33].mxu1 }
 0x1c7   : > { %v954_v29 = vadd.f32 %v3094_v17, %v953_v27 }
 0x1c8   : > { %v1273_v32 = vmax.f32 %v959_v25, 0.0 }
 0x1c9   : > { %v1272_v30 = vmax.f32 %v954_v29, 0.0  ;;  %v2322_v31 = vpop.f32.mrb[34].mxu1 }
 0x1ca   : > { %v969_v33 = vadd.f32 %v2322_v31, %v3094_v17  ;;  %v963_v35 = vpop.f32.mrb[35].mxu1 }
 0x1cb   : > { %v964_v38 = vadd.f32 %v3094_v17, %v963_v35  ;;  %2445 = vmatprep.mubr.f32.mxu0 %v1272_v30 }
 0x1cc   : > { %2446 = vmatmul.mubr.f32.vlgmr.msra.gmra.mrb[32].mxu0 %v1273_v32  ;;  %v1275_v45 = vmax.f32 %v969_v33, 0.0 }
 0x1cd   : > { %v1274_v40 = vmax.f32 %v964_v38, 0.0  ;;  %v2325_v44 = vpop.f32.mrb[36].mxu1 }
 0x1ce   : > { %v979_v46 = vadd.f32 %v2325_v44, %v3094_v17  ;;  %v973_v47 = vpop.f32.mrb[37].mxu1 }
 0x1cf   : > { %v974_v48 = vadd.f32 %v3094_v17, %v973_v47  ;;  %2448 = vmatprep.mubr.f32.mxu0 %v1274_v40 }
 0x1d0   : > { %2449 = vmatmul.mubr.f32.gmra.mrb[34].mxu0 %v1275_v45  ;;  %v1277_v54 = vmax.f32 %v979_v46, 0.0 }
 0x1d1   : > { %v1276_v49 = vmax.f32 %v974_v48, 0.0  ;;  %v2328_v51 = vpop.f32.mrb[38].mxu1 }
 0x1d2   : > { %v989_v56 = vadd.f32 %v2328_v51, %v3094_v17  ;;  %v983_v57 = vpop.f32.mrb[39].mxu1 }
 0x1d3   : > { %v984_v58 = vadd.f32 %v3094_v17, %v983_v57  ;;  %2451 = vmatprep.mubr.f32.mxu0 %v1276_v49 }
 0x1d4   : > { %2452 = vmatmul.mubr.f32.gmra.mrb[36].mxu0 %v1277_v54  ;;  %v1279_v63 = vmax.f32 %v989_v56, 0.0 }
 0x1d5   : > { %v1278_v60 = vmax.f32 %v984_v58, 0.0  ;;  %v2331_v62 = vpop.f32.mrb[40].mxu1 }
 0x1d6   : > { %v999_v0 = vadd.f32 %v2331_v62, %v3094_v17  ;;  %v993_v4 = vpop.f32.mrb[41].mxu1 }
 0x1d7   : > { %v994_v6 = vadd.f32 %v3094_v17, %v993_v4  ;;  %2454 = vmatprep.mubr.f32.mxu0 %v1278_v60 }
 0x1d8   : > { %2455 = vmatmul.mubr.f32.gmra.mrb[38].mxu0 %v1279_v63  ;;  %v1281_v11 = vmax.f32 %v999_v0, 0.0 }
 0x1d9   : > { %v1280_v7 = vmax.f32 %v994_v6, 0.0  ;;  %v2334_v9 = vpop.f32.mrb[42].mxu1 }
 0x1da   : > { %v1009_v12 = vadd.f32 %v2334_v9, %v3094_v17  ;;  %v1003_v43 = vpop.f32.mrb[43].mxu1 }
 0x1db   : > { %v1004_v13 = vadd.f32 %v3094_v17, %v1003_v43  ;;  %2457 = vmatprep.mubr.f32.mxu0 %v1280_v7 }
 0x1dc   : > { %2458 = vmatmul.mubr.f32.gmra.mrb[40].mxu0 %v1281_v11  ;;  %v1283_v36 = vmax.f32 %v1009_v12, 0.0 }
 0x1dd   : > { %v1282_v15 = vmax.f32 %v1004_v13, 0.0  ;;  %v2337_v18 = vpop.f32.mrb[44].mxu1 }
 0x1de   : > { %v1019_v20 = vadd.f32 %v2337_v18, %v3094_v17  ;;  %v1013_v22 = vpop.f32.mrb[45].mxu1 }
 0x1df   : > { %v1014_v61 = vadd.f32 %v3094_v17, %v1013_v22  ;;  %2460 = vmatprep.mubr.f32.mxu0 %v1282_v15 }
 0x1e0   : > { %2461 = vmatmul.mubr.f32.gmra.mrb[42].mxu0 %v1283_v36  ;;  %v1285_v59 = vmax.f32 %v1019_v20, 0.0 }
 0x1e1   : > { %v1284_v42 = vmax.f32 %v1014_v61, 0.0  ;;  %v2340_v10 = vpop.f32.mrb[46].mxu1 }
 0x1e2   : > { %v1029_v23 = vadd.f32 %v2340_v10, %v3094_v17  ;;  %v1023_v8 = vpop.f32.mrb[47].mxu1 }
 0x1e3   : > { %v1024_v37 = vadd.f32 %v3094_v17, %v1023_v8  ;;  %2463 = vmatprep.mubr.f32.mxu0 %v1284_v42 }
 0x1e4   : > { %2464 = vmatmul.mubr.f32.gmra.mrb[44].mxu0 %v1285_v59  ;;  %v1287_v34 = vmax.f32 %v1029_v23, 0.0 }
 0x1e5   : > { %v1286_v21 = vmax.f32 %v1024_v37, 0.0  ;;  %v2343_v52 = vpop.f32.mrb[48].mxu1 }
 0x1e6   : > { %v1039_v3 = vadd.f32 %v2343_v52, %v3094_v17  ;;  %v1033_v50 = vpop.f32.mrb[49].mxu1 }
 0x1e7   : > { %v1034_v16 = vadd.f32 %v3094_v17, %v1033_v50  ;;  %2466 = vmatprep.mubr.f32.mxu0 %v1286_v21 }
 0x1e8   : > { %2467 = vmatmul.mubr.f32.gmra.mrb[46].mxu0 %v1287_v34  ;;  %v1289_v14 = vmax.f32 %v1039_v3, 0.0 }
 0x1e9   : > { %v1288_v1 = vmax.f32 %v1034_v16, 0.0  ;;  %v2346_v28 = vpop.f32.mrb[50].mxu1 }
 0x1ea   : > { %v1049_v41 = vadd.f32 %v2346_v28, %v3094_v17  ;;  %v1043_v26 = vpop.f32.mrb[51].mxu1 }
 0x1eb   : > { %v1044_v55 = vadd.f32 %v3094_v17, %v1043_v26  ;;  %2469 = vmatprep.mubr.f32.mxu0 %v1288_v1 }
 0x1ec   : > { %2470 = vmatmul.mubr.f32.gmra.mrb[48].mxu0 %v1289_v14  ;;  %v1291_v53 = vmax.f32 %v1049_v41, 0.0 }
 0x1ed   : > { %v1290_v39 = vmax.f32 %v1044_v55, 0.0  ;;  %v2349_v5 = vpop.f32.mrb[52].mxu1 }
 0x1ee   : > { %v1059_v19 = vadd.f32 %v2349_v5, %v3094_v17  ;;  %v1053_v2 = vpop.f32.mrb[53].mxu1 }
 0x1ef   : > { %v1054_v24 = vadd.f32 %v3094_v17, %v1053_v2  ;;  %2472 = vmatprep.mubr.f32.mxu0 %v1290_v39 }
 0x1f0   : > { %2473 = vmatmul.mubr.f32.gmra.mrb[50].mxu0 %v1291_v53  ;;  %v1293_v29 = vmax.f32 %v1059_v19, 0.0 }
 0x1f1   : > { %v1292_v25 = vmax.f32 %v1054_v24, 0.0  ;;  %v2352_v27 = vpop.f32.mrb[54].mxu1 }
 0x1f2   : > { %v1069_v30 = vadd.f32 %v2352_v27, %v3094_v17  ;;  %v1063_v31 = vpop.f32.mrb[55].mxu1 }
 0x1f3   : > { %v1064_v32 = vadd.f32 %v3094_v17, %v1063_v31  ;;  %2475 = vmatprep.mubr.f32.mxu0 %v1292_v25 }
 0x1f4   : > { %2476 = vmatmul.mubr.f32.gmra.mrb[52].mxu0 %v1293_v29  ;;  %v1295_v38 = vmax.f32 %v1069_v30, 0.0 }
 0x1f5   : > { %v1294_v33 = vmax.f32 %v1064_v32, 0.0  ;;  %v2355_v35 = vpop.f32.mrb[56].mxu1 }
 0x1f6   : > { %v1079_v40 = vadd.f32 %v2355_v35, %v3094_v17  ;;  %v1073_v44 = vpop.f32.mrb[57].mxu1 }
 0x1f7   : > { %v1074_v45 = vadd.f32 %v3094_v17, %v1073_v44  ;;  %2478 = vmatprep.mubr.f32.mxu0 %v1294_v33 }
 0x1f8   : > { %2479 = vmatmul.mubr.f32.gmra.mrb[54].mxu0 %v1295_v38  ;;  %v1297_v48 = vmax.f32 %v1079_v40, 0.0 }
 0x1f9   : > { %v1296_v46 = vmax.f32 %v1074_v45, 0.0  ;;  %v2358_v47 = vpop.f32.mrb[58].mxu1 }
 0x1fa   : > { %v1089_v49 = vadd.f32 %v2358_v47, %v3094_v17  ;;  %v1083_v51 = vpop.f32.mrb[59].mxu1 }
 0x1fb   : > { %v1084_v54 = vadd.f32 %v3094_v17, %v1083_v51  ;;  %2481 = vmatprep.mubr.f32.mxu0 %v1296_v46 }
 0x1fc   : > { %2482 = vmatmul.mubr.f32.gmra.mrb[56].mxu0 %v1297_v48  ;;  %v1299_v58 = vmax.f32 %v1089_v49, 0.0 }
 0x1fd   : > { %v1298_v56 = vmax.f32 %v1084_v54, 0.0  ;;  %v2361_v57 = vpop.f32.mrb[60].mxu1 }
 0x1fe   : > { %v1099_v60 = vadd.f32 %v2361_v57, %v3094_v17  ;;  %v1093_v62 = vpop.f32.mrb[61].mxu1 }
 0x1ff   : > { %v1094_v63 = vadd.f32 %v3094_v17, %v1093_v62  ;;  %2484 = vmatprep.mubr.f32.mxu0 %v1298_v56 }
 0x200   : > { %2485 = vmatmul.mubr.f32.gmra.mrb[58].mxu0 %v1299_v58  ;;  %v1301_v6 = vmax.f32 %v1099_v60, 0.0 }
 0x201   : > { %v1300_v0 = vmax.f32 %v1094_v63, 0.0  ;;  %v2364_v4 = vpop.f32.mrb[62].mxu1 }
 0x202   : > { %v1109_v7 = vadd.f32 %v2364_v4, %v3094_v17  ;;  %v1103_v9 = vpop.f32.mrb[63].mxu1 }
 0x203   : > { %v1104_v11 = vadd.f32 %v3094_v17, %v1103_v9  ;;  %2487 = vmatprep.mubr.f32.mxu0 %v1300_v0 }
 0x204   : > { %2488 = vmatmul.mubr.f32.gmra.mrb[60].mxu0 %v1301_v6  ;;  %v1303_v13 = vmax.f32 %v1109_v7, 0.0 }
 0x205   : > { %v1302_v12 = vmax.f32 %v1104_v11, 0.0  ;;  %v2367_v43 = vpop.f32.mrb[64].mxu1 }
 0x206   : > { %v1119_v15 = vadd.f32 %v2367_v43, %v3094_v17  ;;  %v1113_v18 = vpop.f32.mrb[65].mxu1 }
 0x207   : > { %v1114_v36 = vadd.f32 %v3094_v17, %v1113_v18  ;;  %2490 = vmatprep.mubr.f32.mxu0 %v1302_v12 }
 0x208   : > { %2491 = vmatmul.mubr.f32.gmra.mrb[62].mxu0 %v1303_v13  ;;  %v1305_v61 = vmax.f32 %v1119_v15, 0.0 }
 0x209   : > { %v1304_v20 = vmax.f32 %v1114_v36, 0.0  ;;  %v2370_v22 = vpop.f32.mrb[66].mxu1 }
 0x20a   : > { %v1129_v42 = vadd.f32 %v2370_v22, %v3094_v17  ;;  %v1123_v10 = vpop.f32.mrb[67].mxu1 }
 0x20b   : > { %v1124_v59 = vadd.f32 %v3094_v17, %v1123_v10  ;;  %2493 = vmatprep.mubr.f32.mxu0 %v1304_v20 }
 0x20c   : > { %2494 = vmatmul.mubr.f32.gmra.mrb[64].mxu0 %v1305_v61  ;;  %v1307_v37 = vmax.f32 %v1129_v42, 0.0 }
 0x20d   : > { %v1306_v23 = vmax.f32 %v1124_v59, 0.0  ;;  %v2373_v8 = vpop.f32.mrb[68].mxu1 }
 0x20e   : > { %v1139_v21 = vadd.f32 %v2373_v8, %v3094_v17  ;;  %v1133_v52 = vpop.f32.mrb[69].mxu1 }
 0x20f   : > { %v1134_v34 = vadd.f32 %v3094_v17, %v1133_v52  ;;  %2496 = vmatprep.mubr.f32.mxu0 %v1306_v23 }
 0x210   : > { %2497 = vmatmul.mubr.f32.gmra.mrb[66].mxu0 %v1307_v37  ;;  %v1309_v16 = vmax.f32 %v1139_v21, 0.0 }
 0x211   : > { %v1308_v3 = vmax.f32 %v1134_v34, 0.0  ;;  %v2376_v50 = vpop.f32.mrb[70].mxu1 }
 0x212   : > { %v1149_v1 = vadd.f32 %v2376_v50, %v3094_v17  ;;  %v1143_v28 = vpop.f32.mrb[71].mxu1 }
 0x213   : > { %v1144_v14 = vadd.f32 %v3094_v17, %v1143_v28  ;;  %2499 = vmatprep.mubr.f32.mxu0 %v1308_v3 }
 0x214   : > { %2500 = vmatmul.mubr.f32.gmra.mrb[68].mxu0 %v1309_v16  ;;  %v1311_v55 = vmax.f32 %v1149_v1, 0.0 }
 0x215   : > { %v1310_v41 = vmax.f32 %v1144_v14, 0.0  ;;  %v2379_v26 = vpop.f32.mrb[72].mxu1 }
 0x216   : > { %v1159_v39 = vadd.f32 %v2379_v26, %v3094_v17  ;;  %v1153_v5 = vpop.f32.mrb[73].mxu1 }
 0x217   : > { %v1154_v53 = vadd.f32 %v3094_v17, %v1153_v5  ;;  %2502 = vmatprep.mubr.f32.mxu0 %v1310_v41 }
 0x218   : > { %2503 = vmatmul.mubr.f32.gmra.mrb[70].mxu0 %v1311_v55  ;;  %v1313_v24 = vmax.f32 %v1159_v39, 0.0 }
 0x219   : > { %v1312_v19 = vmax.f32 %v1154_v53, 0.0  ;;  %v2382_v2 = vpop.f32.mrb[74].mxu1 }
 0x21a   : > { %v1169_v25 = vadd.f32 %v2382_v2, %v3094_v17  ;;  %v1163_v27 = vpop.f32.mrb[75].mxu1 }
 0x21b   : > { %v1164_v29 = vadd.f32 %v3094_v17, %v1163_v27  ;;  %2505 = vmatprep.mubr.f32.mxu0 %v1312_v19 }
 0x21c   : > { %2506 = vmatmul.mubr.f32.gmra.mrb[72].mxu0 %v1313_v24  ;;  %v1315_v32 = vmax.f32 %v1169_v25, 0.0 }
 0x21d   : > { %v1314_v30 = vmax.f32 %v1164_v29, 0.0  ;;  %v2385_v31 = vpop.f32.mrb[76].mxu1  ;;  %v3163_v29 = vld [vmem:[%s3368_s1 + $0x150] ss:$0 sm:$0xff] }
 0x21e   : > { %v1179_v33 = vadd.f32 %v2385_v31, %v3094_v17  ;;  %v1173_v35 = vpop.f32.mrb[77].mxu1 }
 0x21f   : > { %v1174_v38 = vadd.f32 %v3094_v17, %v1173_v35  ;;  %2508 = vmatprep.mubr.f32.mxu0 %v1314_v30 }
 0x220   : > { %2509 = vmatmul.mubr.f32.gmra.mrb[74].mxu0 %v1315_v32  ;;  %v1317_v45 = vmax.f32 %v1179_v33, 0.0 }
 0x221   : > { %v1316_v40 = vmax.f32 %v1174_v38, 0.0  ;;  %v2388_v44 = vpop.f32.mrb[78].mxu1 }
 0x222   : > { %v1189_v46 = vadd.f32 %v2388_v44, %v3094_v17  ;;  %v1183_v47 = vpop.f32.mrb[79].mxu1 }
 0x223   : > { %v1184_v48 = vadd.f32 %v3094_v17, %v1183_v47  ;;  %2511 = vmatprep.mubr.f32.mxu0 %v1316_v40 }
 0x224   : > { %2512 = vmatmul.mubr.f32.gmra.mrb[76].mxu0 %v1317_v45  ;;  %v1319_v54 = vmax.f32 %v1189_v46, 0.0 }
 0x225   : > { %v1318_v49 = vmax.f32 %v1184_v48, 0.0  ;;  %v2391_v51 = vpop.f32.mrb[80].mxu1 }
 0x226   : > { %v1199_v56 = vadd.f32 %v2391_v51, %v3094_v17  ;;  %v1193_v57 = vpop.f32.mrb[81].mxu1 }
 0x227   : > { %v1194_v58 = vadd.f32 %v3094_v17, %v1193_v57  ;;  %2514 = vmatprep.mubr.f32.mxu0 %v1318_v49 }
 0x228   : > { %2515 = vmatmul.mubr.f32.gmra.mrb[78].mxu0 %v1319_v54  ;;  %v1321_v63 = vmax.f32 %v1199_v56, 0.0 }
 0x229   : > { %v1320_v60 = vmax.f32 %v1194_v58, 0.0  ;;  %v2394_v62 = vpop.f32.mrb[82].mxu1 }
 0x22a   : > { %v1209_v0 = vadd.f32 %v2394_v62, %v3094_v17  ;;  %v1203_v4 = vpop.f32.mrb[83].mxu1 }
 0x22b   : > { %v1204_v6 = vadd.f32 %v3094_v17, %v1203_v4  ;;  %2517 = vmatprep.mubr.f32.mxu0 %v1320_v60 }
 0x22c   : > { %2518 = vmatmul.mubr.f32.gmra.mrb[80].mxu0 %v1321_v63  ;;  %v1323_v11 = vmax.f32 %v1209_v0, 0.0 }
 0x22d   : > { %v1322_v7 = vmax.f32 %v1204_v6, 0.0  ;;  %v2397_v9 = vpop.f32.mrb[84].mxu1 }
 0x22e   : > { %v1219_v12 = vadd.f32 %v2397_v9, %v3094_v17  ;;  %v1213_v43 = vpop.f32.mrb[85].mxu1 }
 0x22f   : > { %v1214_v13 = vadd.f32 %v3094_v17, %v1213_v43  ;;  %2520 = vmatprep.mubr.f32.mxu0 %v1322_v7 }
 0x230   : > { %2521 = vmatmul.mubr.f32.gmra.mrb[82].mxu0 %v1323_v11  ;;  %v1325_v36 = vmax.f32 %v1219_v12, 0.0 }
 0x231   : > { %v1324_v15 = vmax.f32 %v1214_v13, 0.0  ;;  %v2400_v18 = vpop.f32.mrb[86].mxu1 }
 0x232   : > { %v1229_v20 = vadd.f32 %v2400_v18, %v3094_v17  ;;  %v1223_v22 = vpop.f32.mrb[87].mxu1 }
 0x233   : > { %v1224_v61 = vadd.f32 %v3094_v17, %v1223_v22  ;;  %2523 = vmatprep.mubr.f32.mxu0 %v1324_v15 }
 0x234   : > { %2524 = vmatmul.mubr.f32.gmra.mrb[84].mxu0 %v1325_v36  ;;  %v1327_v59 = vmax.f32 %v1229_v20, 0.0 }
 0x235   : > { %v1326_v42 = vmax.f32 %v1224_v61, 0.0  ;;  %v2403_v10 = vpop.f32.mrb[88].mxu1 }
 0x236   : > { %v1239_v23 = vadd.f32 %v2403_v10, %v3094_v17  ;;  %v1233_v8 = vpop.f32.mrb[89].mxu1 }
 0x237   : > { %v1234_v37 = vadd.f32 %v3094_v17, %v1233_v8  ;;  %2526 = vmatprep.mubr.f32.mxu0 %v1326_v42 }
 0x238   : > { %2527 = vmatmul.mubr.f32.gmra.mrb[86].mxu0 %v1327_v59  ;;  %v1329_v34 = vmax.f32 %v1239_v23, 0.0 }
 0x239   : > { %v1328_v21 = vmax.f32 %v1234_v37, 0.0  ;;  %v2406_v52 = vpop.f32.mrb[90].mxu1 }
 0x23a   : > { %v1249_v3 = vadd.f32 %v2406_v52, %v3094_v17  ;;  %v1243_v50 = vpop.f32.mrb[91].mxu1 }
 0x23b   : > { %v1244_v16 = vadd.f32 %v3094_v17, %v1243_v50  ;;  %2529 = vmatprep.mubr.f32.mxu0 %v1328_v21 }
 0x23c   : > { %2530 = vmatmul.mubr.f32.gmra.mrb[88].mxu0 %v1329_v34  ;;  %v1331_v14 = vmax.f32 %v1249_v3, 0.0 }
 0x23d   : > { %v1330_v1 = vmax.f32 %v1244_v16, 0.0  ;;  %v2409_v28 = vpop.f32.mrb[92].mxu1 }
 0x23e   : > { %v1259_v41 = vadd.f32 %v2409_v28, %v3094_v17  ;;  %v1253_v26 = vpop.f32.mrb[93].mxu1 }
 0x23f   : > { %v1254_v55 = vadd.f32 %v3094_v17, %v1253_v26  ;;  %2532 = vmatprep.mubr.f32.mxu0 %v1330_v1 }
 0x240   : > { %2533 = vmatmul.mubr.f32.gmra.mrb[90].mxu0 %v1331_v14  ;;  %v1333_v53 = vmax.f32 %v1259_v41, 0.0 }
 0x241   : > { %v1332_v39 = vmax.f32 %v1254_v55, 0.0  ;;  %v2412_v5 = vpop.f32.mrb[94].mxu1 }
 0x242   : > { %v1269_v19 = vadd.f32 %v2412_v5, %v3094_v17  ;;  %v1263_v2 = vpop.f32.mrb[95].mxu1 }
 0x243   : > { %v1264_v24 = vadd.f32 %v3094_v17, %v1263_v2  ;;  %2535 = vmatprep.mubr.f32.mxu0 %v1332_v39 }
 0x244   : > { %2536 = vmatmul.mubr.f32.gmra.mrb[92].mxu0 %v1333_v53  ;;  %v1335_v27 = vmax.f32 %v1269_v19, 0.0 }
 0x245   : > { %v1334_v25 = vmax.f32 %v1264_v24, 0.0 }
 0x247   : > { %2538 = vmatprep.mubr.f32.mxu0 %v1334_v25 }
 0x248   : > { %2539 = vmatmul.mubr.f32.gmra.mrb[94].mxu0 %v1335_v27 }
 0x29f   : > { %v2447_v17 = vpop.f32.mrb[32].mxu0 }
 0x2a0   : > { %v1429_v30 = vadd.f32 %v2447_v17, %v3163_v29  ;;  %v1423_v31 = vpop.f32.mrb[33].mxu0 }
 0x2a1   : > { %v1424_v32 = vadd.f32 %v3163_v29, %v1423_v31 }
 0x2a2   : > { %1744 = vst.msk [vmem:[%s3170_s29 + $0x8] sm:$0xff] %vm1742_vm1, %v1429_v30 }
 0x2a3   : > { %1743 = vst.msk [vmem:[%s3170_s29] sm:$0xff] %vm1742_vm1, %v1424_v32  ;;  %v2450_v33 = vpop.f32.mrb[34].mxu0 }
 0x2a4   : > { %v1439_v35 = vadd.f32 %v2450_v33, %v3163_v29  ;;  %v1433_v38 = vpop.f32.mrb[35].mxu0 }
 0x2a5   : > { %v1434_v40 = vadd.f32 %v3163_v29, %v1433_v38 }
 0x2a6   : > { %1746 = vst.msk [vmem:[%s3170_s29 + $0x18] sm:$0xff] %vm1742_vm1, %v1439_v35 }
 0x2a7   : > { %1745 = vst.msk [vmem:[%s3170_s29 + $0x10] sm:$0xff] %vm1742_vm1, %v1434_v40  ;;  %v2453_v44 = vpop.f32.mrb[36].mxu0 }
 0x2a8   : > { %v1449_v45 = vadd.f32 %v2453_v44, %v3163_v29  ;;  %v1443_v46 = vpop.f32.mrb[37].mxu0 }
 0x2a9   : > { %v1444_v47 = vadd.f32 %v3163_v29, %v1443_v46 }
 0x2aa   : > { %1748 = vst.msk [vmem:[%s3170_s29 + $0x28] sm:$0xff] %vm1742_vm1, %v1449_v45 }
 0x2ab   : > { %1747 = vst.msk [vmem:[%s3170_s29 + $0x20] sm:$0xff] %vm1742_vm1, %v1444_v47  ;;  %v2456_v48 = vpop.f32.mrb[38].mxu0 }
 0x2ac   : > { %v1459_v49 = vadd.f32 %v2456_v48, %v3163_v29  ;;  %v1453_v51 = vpop.f32.mrb[39].mxu0 }
 0x2ad   : > { %v1454_v54 = vadd.f32 %v3163_v29, %v1453_v51 }
 0x2ae   : > { %1750 = vst.msk [vmem:[%s3170_s29 + $0x38] sm:$0xff] %vm1742_vm1, %v1459_v49 }
 0x2af   : > { %1749 = vst.msk [vmem:[%s3170_s29 + $0x30] sm:$0xff] %vm1742_vm1, %v1454_v54  ;;  %v2459_v56 = vpop.f32.mrb[40].mxu0 }
 0x2b0   : > { %v1469_v57 = vadd.f32 %v2459_v56, %v3163_v29  ;;  %v1463_v58 = vpop.f32.mrb[41].mxu0 }
 0x2b1   : > { %v1464_v60 = vadd.f32 %v3163_v29, %v1463_v58 }
 0x2b2   : > { %1752 = vst.msk [vmem:[%s3170_s29 + $0x48] sm:$0xff] %vm1742_vm1, %v1469_v57 }
 0x2b3   : > { %1751 = vst.msk [vmem:[%s3170_s29 + $0x40] sm:$0xff] %vm1742_vm1, %v1464_v60  ;;  %v2462_v62 = vpop.f32.mrb[42].mxu0 }
 0x2b4   : > { %v1479_v63 = vadd.f32 %v2462_v62, %v3163_v29  ;;  %v1473_v0 = vpop.f32.mrb[43].mxu0 }
 0x2b5   : > { %v1474_v4 = vadd.f32 %v3163_v29, %v1473_v0 }
 0x2b6   : > { %1754 = vst.msk [vmem:[%s3170_s29 + $0x58] sm:$0xff] %vm1742_vm1, %v1479_v63 }
 0x2b7   : > { %1753 = vst.msk [vmem:[%s3170_s29 + $0x50] sm:$0xff] %vm1742_vm1, %v1474_v4  ;;  %v2465_v6 = vpop.f32.mrb[44].mxu0 }
 0x2b8   : > { %v1489_v7 = vadd.f32 %v2465_v6, %v3163_v29  ;;  %v1483_v9 = vpop.f32.mrb[45].mxu0 }
 0x2b9   : > { %v1484_v11 = vadd.f32 %v3163_v29, %v1483_v9 }
 0x2ba   : > { %1756 = vst.msk [vmem:[%s3170_s29 + $0x68] sm:$0xff] %vm1742_vm1, %v1489_v7 }
 0x2bb   : > { %1755 = vst.msk [vmem:[%s3170_s29 + $0x60] sm:$0xff] %vm1742_vm1, %v1484_v11  ;;  %v2468_v12 = vpop.f32.mrb[46].mxu0 }
 0x2bc   : > { %v1499_v43 = vadd.f32 %v2468_v12, %v3163_v29  ;;  %v1493_v13 = vpop.f32.mrb[47].mxu0 }
 0x2bd   : > { %v1494_v15 = vadd.f32 %v3163_v29, %v1493_v13 }
 0x2be   : > { %1758 = vst.msk [vmem:[%s3170_s29 + $0x78] sm:$0xff] %vm1742_vm1, %v1499_v43 }
 0x2bf   : > { %1757 = vst.msk [vmem:[%s3170_s29 + $0x70] sm:$0xff] %vm1742_vm1, %v1494_v15  ;;  %v2471_v18 = vpop.f32.mrb[48].mxu0 }
 0x2c0   : > { %v1509_v36 = vadd.f32 %v2471_v18, %v3163_v29  ;;  %v1503_v20 = vpop.f32.mrb[49].mxu0 }
 0x2c1   : > { %v1504_v22 = vadd.f32 %v3163_v29, %v1503_v20 }
 0x2c2   : > { %1760 = vst.msk [vmem:[%s3170_s29 + $0x88] sm:$0xff] %vm1742_vm1, %v1509_v36 }
 0x2c3   : > { %1759 = vst.msk [vmem:[%s3170_s29 + $0x80] sm:$0xff] %vm1742_vm1, %v1504_v22  ;;  %v2474_v61 = vpop.f32.mrb[50].mxu0 }
 0x2c4   : > { %v1519_v42 = vadd.f32 %v2474_v61, %v3163_v29  ;;  %v1513_v10 = vpop.f32.mrb[51].mxu0 }
 0x2c5   : > { %v1514_v59 = vadd.f32 %v3163_v29, %v1513_v10 }
 0x2c6   : > { %1762 = vst.msk [vmem:[%s3170_s29 + $0x98] sm:$0xff] %vm1742_vm1, %v1519_v42 }
 0x2c7   : > { %1761 = vst.msk [vmem:[%s3170_s29 + $0x90] sm:$0xff] %vm1742_vm1, %v1514_v59  ;;  %v2477_v23 = vpop.f32.mrb[52].mxu0 }
 0x2c8   : > { %v1529_v8 = vadd.f32 %v2477_v23, %v3163_v29  ;;  %v1523_v37 = vpop.f32.mrb[53].mxu0 }
 0x2c9   : > { %v1524_v21 = vadd.f32 %v3163_v29, %v1523_v37 }
 0x2ca   : > { %1764 = vst.msk [vmem:[%s3170_s29 + $0xa8] sm:$0xff] %vm1742_vm1, %v1529_v8 }
 0x2cb   : > { %1763 = vst.msk [vmem:[%s3170_s29 + $0xa0] sm:$0xff] %vm1742_vm1, %v1524_v21  ;;  %v2480_v52 = vpop.f32.mrb[54].mxu0 }
 0x2cc   : > { %v1539_v34 = vadd.f32 %v2480_v52, %v3163_v29  ;;  %v1533_v3 = vpop.f32.mrb[55].mxu0 }
 0x2cd   : > { %v1534_v50 = vadd.f32 %v3163_v29, %v1533_v3 }
 0x2ce   : > { %1766 = vst.msk [vmem:[%s3170_s29 + $0xb8] sm:$0xff] %vm1742_vm1, %v1539_v34 }
 0x2cf   : > { %1765 = vst.msk [vmem:[%s3170_s29 + $0xb0] sm:$0xff] %vm1742_vm1, %v1534_v50  ;;  %v2483_v16 = vpop.f32.mrb[56].mxu0 }
 0x2d0   : > { %v1549_v1 = vadd.f32 %v2483_v16, %v3163_v29  ;;  %v1543_v28 = vpop.f32.mrb[57].mxu0 }
 0x2d1   : > { %v1544_v14 = vadd.f32 %v3163_v29, %v1543_v28 }
 0x2d2   : > { %1768 = vst.msk [vmem:[%s3170_s29 + $0xc8] sm:$0xff] %vm1742_vm1, %v1549_v1 }
 0x2d3   : > { %1767 = vst.msk [vmem:[%s3170_s29 + $0xc0] sm:$0xff] %vm1742_vm1, %v1544_v14  ;;  %v2486_v41 = vpop.f32.mrb[58].mxu0 }
 0x2d4   : > { %v1559_v26 = vadd.f32 %v2486_v41, %v3163_v29  ;;  %v1553_v55 = vpop.f32.mrb[59].mxu0 }
 0x2d5   : > { %v1554_v39 = vadd.f32 %v3163_v29, %v1553_v55 }
 0x2d6   : > { %1770 = vst.msk [vmem:[%s3170_s29 + $0xd8] sm:$0xff] %vm1742_vm1, %v1559_v26 }
 0x2d7   : > { %1769 = vst.msk [vmem:[%s3170_s29 + $0xd0] sm:$0xff] %vm1742_vm1, %v1554_v39  ;;  %v2489_v5 = vpop.f32.mrb[60].mxu0 }
 0x2d8   : > { %v1569_v53 = vadd.f32 %v2489_v5, %v3163_v29  ;;  %v1563_v19 = vpop.f32.mrb[61].mxu0 }
 0x2d9   : > { %v1564_v2 = vadd.f32 %v3163_v29, %v1563_v19 }
 0x2da   : > { %1772 = vst.msk [vmem:[%s3170_s29 + $0xe8] sm:$0xff] %vm1742_vm1, %v1569_v53 }
 0x2db   : > { %1771 = vst.msk [vmem:[%s3170_s29 + $0xe0] sm:$0xff] %vm1742_vm1, %v1564_v2  ;;  %v2492_v24 = vpop.f32.mrb[62].mxu0 }
 0x2dc   : > { %v1579_v25 = vadd.f32 %v2492_v24, %v3163_v29  ;;  %v1573_v27 = vpop.f32.mrb[63].mxu0 }
 0x2dd   : > { %v1574_v17 = vadd.f32 %v3163_v29, %v1573_v27 }
 0x2de   : > { %1774 = vst.msk [vmem:[%s3170_s29 + $0xf8] sm:$0xff] %vm1742_vm1, %v1579_v25 }
 0x2df   : > { %1773 = vst.msk [vmem:[%s3170_s29 + $0xf0] sm:$0xff] %vm1742_vm1, %v1574_v17  ;;  %v2495_v30 = vpop.f32.mrb[64].mxu0 }
 0x2e0   : > { %v1589_v31 = vadd.f32 %v2495_v30, %v3163_v29  ;;  %v1583_v32 = vpop.f32.mrb[65].mxu0 }
 0x2e1   : > { %v1584_v33 = vadd.f32 %v3163_v29, %v1583_v32 }
 0x2e2   : > { %1776 = vst.msk [vmem:[%s3170_s29 + $0x108] sm:$0xff] %vm1742_vm1, %v1589_v31 }
 0x2e3   : > { %1775 = vst.msk [vmem:[%s3170_s29 + $0x100] sm:$0xff] %vm1742_vm1, %v1584_v33  ;;  %v2498_v35 = vpop.f32.mrb[66].mxu0 }
 0x2e4   : > { %v1599_v38 = vadd.f32 %v2498_v35, %v3163_v29  ;;  %v1593_v40 = vpop.f32.mrb[67].mxu0 }
 0x2e5   : > { %v1594_v44 = vadd.f32 %v3163_v29, %v1593_v40 }
 0x2e6   : > { %1778 = vst.msk [vmem:[%s3170_s29 + $0x118] sm:$0xff] %vm1742_vm1, %v1599_v38 }
 0x2e7   : > { %1777 = vst.msk [vmem:[%s3170_s29 + $0x110] sm:$0xff] %vm1742_vm1, %v1594_v44  ;;  %v2501_v45 = vpop.f32.mrb[68].mxu0 }
 0x2e8   : > { %v1609_v46 = vadd.f32 %v2501_v45, %v3163_v29  ;;  %v1603_v47 = vpop.f32.mrb[69].mxu0 }
 0x2e9   : > { %v1604_v48 = vadd.f32 %v3163_v29, %v1603_v47 }
 0x2ea   : > { %1780 = vst.msk [vmem:[%s3170_s29 + $0x128] sm:$0xff] %vm1742_vm1, %v1609_v46 }
 0x2eb   : > { %1779 = vst.msk [vmem:[%s3170_s29 + $0x120] sm:$0xff] %vm1742_vm1, %v1604_v48  ;;  %v2504_v49 = vpop.f32.mrb[70].mxu0 }
 0x2ec   : > { %v1619_v51 = vadd.f32 %v2504_v49, %v3163_v29  ;;  %v1613_v54 = vpop.f32.mrb[71].mxu0 }
 0x2ed   : > { %v1614_v56 = vadd.f32 %v3163_v29, %v1613_v54 }
 0x2ee   : > { %1782 = vst.msk [vmem:[%s3170_s29 + $0x138] sm:$0xff] %vm1742_vm1, %v1619_v51 }
 0x2ef   : > { %1781 = vst.msk [vmem:[%s3170_s29 + $0x130] sm:$0xff] %vm1742_vm1, %v1614_v56  ;;  %v2507_v57 = vpop.f32.mrb[72].mxu0 }
 0x2f0   : > { %v1629_v58 = vadd.f32 %v2507_v57, %v3163_v29  ;;  %v1623_v60 = vpop.f32.mrb[73].mxu0 }
 0x2f1   : > { %v1624_v62 = vadd.f32 %v3163_v29, %v1623_v60 }
 0x2f2   : > { %1784 = vst.msk [vmem:[%s3170_s29 + $0x148] sm:$0xff] %vm1742_vm1, %v1629_v58 }
 0x2f3   : > { %1783 = vst.msk [vmem:[%s3170_s29 + $0x140] sm:$0xff] %vm1742_vm1, %v1624_v62  ;;  %v2510_v63 = vpop.f32.mrb[74].mxu0 }
 0x2f4   : > { %v1639_v0 = vadd.f32 %v2510_v63, %v3163_v29  ;;  %v1633_v4 = vpop.f32.mrb[75].mxu0 }
 0x2f5   : > { %v1634_v6 = vadd.f32 %v3163_v29, %v1633_v4 }
 0x2f6   : > { %1786 = vst.msk [vmem:[%s3170_s29 + $0x158] sm:$0xff] %vm1742_vm1, %v1639_v0 }
 0x2f7   : > { %1785 = vst.msk [vmem:[%s3170_s29 + $0x150] sm:$0xff] %vm1742_vm1, %v1634_v6  ;;  %v2513_v7 = vpop.f32.mrb[76].mxu0 }
 0x2f8   : > { %v1649_v9 = vadd.f32 %v2513_v7, %v3163_v29  ;;  %v1643_v11 = vpop.f32.mrb[77].mxu0 }
 0x2f9   : > { %v1644_v12 = vadd.f32 %v3163_v29, %v1643_v11 }
 0x2fa   : > { %1788 = vst.msk [vmem:[%s3170_s29 + $0x168] sm:$0xff] %vm1742_vm1, %v1649_v9 }
 0x2fb   : > { %1787 = vst.msk [vmem:[%s3170_s29 + $0x160] sm:$0xff] %vm1742_vm1, %v1644_v12  ;;  %v2516_v43 = vpop.f32.mrb[78].mxu0 }
 0x2fc   : > { %v1659_v13 = vadd.f32 %v2516_v43, %v3163_v29  ;;  %v1653_v15 = vpop.f32.mrb[79].mxu0 }
 0x2fd   : > { %v1654_v18 = vadd.f32 %v3163_v29, %v1653_v15 }
 0x2fe   : > { %1790 = vst.msk [vmem:[%s3170_s29 + $0x178] sm:$0xff] %vm1742_vm1, %v1659_v13 }
 0x2ff   : > { %1789 = vst.msk [vmem:[%s3170_s29 + $0x170] sm:$0xff] %vm1742_vm1, %v1654_v18  ;;  %v2519_v36 = vpop.f32.mrb[80].mxu0 }
 0x300   : > { %v1669_v20 = vadd.f32 %v2519_v36, %v3163_v29  ;;  %v1663_v22 = vpop.f32.mrb[81].mxu0 }
 0x301   : > { %v1664_v61 = vadd.f32 %v3163_v29, %v1663_v22 }
 0x302   : > { %1792 = vst.msk [vmem:[%s3170_s29 + $0x188] sm:$0xff] %vm1742_vm1, %v1669_v20 }
 0x303   : > { %1791 = vst.msk [vmem:[%s3170_s29 + $0x180] sm:$0xff] %vm1742_vm1, %v1664_v61  ;;  %v2522_v42 = vpop.f32.mrb[82].mxu0 }
 0x304   : > { %v1679_v10 = vadd.f32 %v2522_v42, %v3163_v29  ;;  %v1673_v59 = vpop.f32.mrb[83].mxu0 }
 0x305   : > { %v1674_v23 = vadd.f32 %v3163_v29, %v1673_v59 }
 0x306   : > { %1794 = vst.msk [vmem:[%s3170_s29 + $0x198] sm:$0xff] %vm1742_vm1, %v1679_v10 }
 0x307   : > { %1793 = vst.msk [vmem:[%s3170_s29 + $0x190] sm:$0xff] %vm1742_vm1, %v1674_v23  ;;  %v2525_v8 = vpop.f32.mrb[84].mxu0 }
 0x308   : > { %v1689_v37 = vadd.f32 %v2525_v8, %v3163_v29  ;;  %v1683_v21 = vpop.f32.mrb[85].mxu0 }
 0x309   : > { %v1684_v52 = vadd.f32 %v3163_v29, %v1683_v21 }
 0x30a   : > { %1796 = vst.msk [vmem:[%s3170_s29 + $0x1a8] sm:$0xff] %vm1742_vm1, %v1689_v37 }
 0x30b   : > { %1795 = vst.msk [vmem:[%s3170_s29 + $0x1a0] sm:$0xff] %vm1742_vm1, %v1684_v52  ;;  %v2528_v34 = vpop.f32.mrb[86].mxu0 }
 0x30c   : > { %v1699_v3 = vadd.f32 %v2528_v34, %v3163_v29  ;;  %v1693_v50 = vpop.f32.mrb[87].mxu0 }
 0x30d   : > { %v1694_v16 = vadd.f32 %v3163_v29, %v1693_v50 }
 0x30e   : > { %1798 = vst.msk [vmem:[%s3170_s29 + $0x1b8] sm:$0xff] %vm1742_vm1, %v1699_v3 }
 0x30f   : > { %1797 = vst.msk [vmem:[%s3170_s29 + $0x1b0] sm:$0xff] %vm1742_vm1, %v1694_v16  ;;  %v2531_v1 = vpop.f32.mrb[88].mxu0 }
 0x310   : > { %v1709_v28 = vadd.f32 %v2531_v1, %v3163_v29  ;;  %v1703_v14 = vpop.f32.mrb[89].mxu0 }
 0x311   : > { %v1704_v41 = vadd.f32 %v3163_v29, %v1703_v14 }
 0x312   : > { %1800 = vst.msk [vmem:[%s3170_s29 + $0x1c8] sm:$0xff] %vm1742_vm1, %v1709_v28 }
 0x313   : > { %1799 = vst.msk [vmem:[%s3170_s29 + $0x1c0] sm:$0xff] %vm1742_vm1, %v1704_v41  ;;  %v2534_v26 = vpop.f32.mrb[90].mxu0 }
 0x314   : > { %v1719_v55 = vadd.f32 %v2534_v26, %v3163_v29  ;;  %v1713_v39 = vpop.f32.mrb[91].mxu0 }
 0x315   : > { %v1714_v5 = vadd.f32 %v3163_v29, %v1713_v39 }
 0x316   : > { %1802 = vst.msk [vmem:[%s3170_s29 + $0x1d8] sm:$0xff] %vm1742_vm1, %v1719_v55 }
 0x317   : > { %1801 = vst.msk [vmem:[%s3170_s29 + $0x1d0] sm:$0xff] %vm1742_vm1, %v1714_v5  ;;  %v2537_v53 = vpop.f32.mrb[92].mxu0 }
 0x318   : > { %v1729_v19 = vadd.f32 %v2537_v53, %v3163_v29  ;;  %v1723_v2 = vpop.f32.mrb[93].mxu0 }
 0x319   : > { %v1724_v24 = vadd.f32 %v3163_v29, %v1723_v2 }
 0x31a   : > { %1804 = vst.msk [vmem:[%s3170_s29 + $0x1e8] sm:$0xff] %vm1742_vm1, %v1729_v19 }
 0x31b   : > { %1803 = vst.msk [vmem:[%s3170_s29 + $0x1e0] sm:$0xff] %vm1742_vm1, %v1724_v24  ;;  %v2540_v25 = vpop.f32.mrb[94].mxu0 }
 0x31c   : > { %v1739_v27 = vadd.f32 %v2540_v25, %v3163_v29  ;;  %v1733_v17 = vpop.f32.mrb[95].mxu0 }
 0x31d   : > { %v1734_v30 = vadd.f32 %v3163_v29, %v1733_v17 }
 0x31e   : > { %1806 = vst.msk [vmem:[%s3170_s29 + $0x1f8] sm:$0xff] %vm1742_vm1, %v1739_v27 }
 0x31f   : > { %1805 = vst.msk [vmem:[%s3170_s29 + $0x1f0] sm:$0xff] %vm1742_vm1, %v1734_v30 }
 0x320 PF: > { %s12_s9 = sadd.s32 1, %s2643_s9  }
 0x321   : > { %p9_p4 = scmp.ge.s32.totalorder %s12_s9, 4  }
 0x323   :  { %11 = sbr.rel (!%p9_p4) target bundleno = 1 (0x1), region = 58 }

</bundles_post_ra>
